<compile_context>
chip_gen: v7x
topology: tpu7x:2x2x1
jax: 0.10.0
libtpu: 0.0.40
codegen_flags: <defaults>
</compile_context>

<pallas_src>
import functools
import math

import jax
import jax.numpy as jnp
from jax import lax
from jax.experimental import pallas as pl
from jax.experimental.pallas import tpu as pltpu


_GROUP = 8  # timesteps per unrolled group: one sublane-aligned (8, 4H) xproj load


def _round_up(x, m):
    return (x + m - 1) // m * m


# ----------------------------------------------------------------------------
# Kernel
# ----------------------------------------------------------------------------
def _music_kernel(num_layers, hidden_size, seq_len, *refs):
    """Stacked LSTM recurrence + output projection, all in VMEM.

    refs layout:
      x(seq,D),
      [w_ih_T(in,4H), w_hh_T(H,4H), b(1,4H)] * num_layers   (gate cols i,f,o,g),
      w_out_T(H,Dpad), b_out(1,Dpad),
      out(seq,Dpad),
      scratch: xproj(seq,4H), hout(seq,H)
    """
    H = hidden_size
    idx = 0
    x_ref = refs[idx]; idx += 1
    layer_refs = []
    for _ in range(num_layers):
        layer_refs.append((refs[idx], refs[idx + 1], refs[idx + 2]))
        idx += 3
    w_out_ref = refs[idx]; idx += 1
    b_out_ref = refs[idx]; idx += 1
    out_ref = refs[idx]; idx += 1
    xproj_ref = refs[idx]; idx += 1
    hout_ref = refs[idx]; idx += 1

    G = min(_GROUP, seq_len)
    n_full = seq_len // G
    rem = seq_len - n_full * G

    for layer in range(num_layers):
        w_ih_ref, w_hh_ref, b_ref = layer_refs[layer]

        # Seq-wide input projection: one MXU matmul per layer.  hout_ref is
        # fully read here BEFORE the time loop below overwrites it, so there is
        # no read/write aliasing across layers.
        layer_in = x_ref[...] if layer == 0 else hout_ref[...]
        xproj_ref[...] = (
            jnp.dot(layer_in, w_ih_ref[...], preferred_element_type=jnp.float32)
            + b_ref[...]
        )

        # Hoist the loop-invariant recurrent weight only while it is cheap to
        # keep in vregs (4 vregs at H=32); re-read per step for larger H.
        if H <= 64:
            _w_hh_hoisted = w_hh_ref[...]  # (H, 4H)

            def get_w_hh(_w=_w_hh_hoisted):
                return _w
        else:
            def get_w_hh():
                return w_hh_ref[...]

        def run_group(h, c, xg, g_size, _get_w_hh=get_w_hh):
            """Run g_size timesteps on one preloaded (g_size, 4H) xproj block."""
            w_hh = _get_w_hh()
            rows = []
            for j in range(g_size):
                gates = xg[j:j + 1, :] + jnp.dot(
                    h, w_hh, preferred_element_type=jnp.float32
                )  # (1, 4H), gate columns packed as (i, f, o, g)
                sg = jax.nn.sigmoid(gates[:, 0:3 * H])   # one contiguous (1,3H) EUP pass
                gg = jnp.tanh(gates[:, 3 * H:4 * H])     # one (1,H) EUP pass
                i_t = sg[:, 0 * H:1 * H]
                f_t = sg[:, 1 * H:2 * H]
                o_t = sg[:, 2 * H:3 * H]
                c = f_t * c + i_t * gg
                h = o_t * jnp.tanh(c)
                rows.append(h)  # stays in vregs; stored once per group below
            return h, c, jnp.concatenate(rows, axis=0)

        h = jnp.zeros((1, H), jnp.float32)  # init_hidden(): zeros
        c = jnp.zeros((1, H), jnp.float32)

        if n_full > 0:
            if n_full <= 4:
                # Short sequence: fully static group loop (static offsets).
                for gi in range(n_full):
                    t0 = gi * G
                    xg = xproj_ref[pl.ds(t0, G), :]
                    h, c, hg = run_group(h, c, xg, G)
                    hout_ref[pl.ds(t0, G), :] = hg
            else:
                def group_step(gi, carry):
                    hh, cc = carry
                    t0 = pl.multiple_of(gi * G, G)
                    xg = xproj_ref[pl.ds(t0, G), :]
                    hh, cc, hg = run_group(hh, cc, xg, G)
                    hout_ref[pl.ds(t0, G), :] = hg
                    return (hh, cc)

                h, c = lax.fori_loop(0, n_full, group_step, (h, c))

        if rem:
            t0 = n_full * G
            xg = xproj_ref[pl.ds(t0, rem), :]
            h, c, hg = run_group(h, c, xg, rem)
            hout_ref[pl.ds(t0, rem), :] = hg

    # hidden2out: (seq, H) @ (H, Dpad) + b -- one matmul + one lane-dense store.
    out_ref[...] = (
        jnp.dot(hout_ref[...], w_out_ref[...], preferred_element_type=jnp.float32)
        + b_out_ref[...]
    ).astype(out_ref.dtype)


# ----------------------------------------------------------------------------
# One-time parameter packing (transpose / gate reorder / bias sums / padding)
# ----------------------------------------------------------------------------
def _reorder_gates(w, H):
    """Rows (i, f, g, o) in PyTorch order -> packed order (i, f, o, g)."""
    i = w[0 * H:1 * H]
    f = w[1 * H:2 * H]
    g = w[2 * H:3 * H]
    o = w[3 * H:4 * H]
    return jnp.concatenate([i, f, o, g], axis=0)


def prepare_inputs(params, *, input_size, hidden_size, num_layers):
    H = hidden_size
    d_pad = _round_up(input_size, 128)
    packed = []
    for l in range(num_layers):
        w_ih, w_hh, b_ih, b_hh = params[f"lstm_l{l}"]
        w_ih = _reorder_gates(w_ih.astype(jnp.float32), H)
        w_hh = _reorder_gates(w_hh.astype(jnp.float32), H)
        b = _reorder_gates((b_ih + b_hh).astype(jnp.float32), H)
        packed.append(jnp.transpose(w_ih))                 # (in, 4H), cols i,f,o,g
        packed.append(jnp.transpose(w_hh))                 # (H, 4H)
        packed.append(b.reshape(1, 4 * H))                 # (1, 4H)
    w_out, b_out = params["hidden2out"]
    w_out_t = jnp.transpose(w_out).astype(jnp.float32)     # (H, D)
    b_out2 = b_out.reshape(1, input_size).astype(jnp.float32)
    if d_pad != input_size:                                # lane-dense output slab
        w_out_t = jnp.pad(w_out_t, ((0, 0), (0, d_pad - input_size)))
        b_out2 = jnp.pad(b_out2, ((0, 0), (0, d_pad - input_size)))
    packed.append(w_out_t)                                 # (H, d_pad)
    packed.append(b_out2)                                  # (1, d_pad)
    return packed


# ----------------------------------------------------------------------------
# Wrapper
# ----------------------------------------------------------------------------
def music_forward(x, packed_weights, *, input_size, hidden_size, num_layers):
    """x: (seq, 1, input_size) float32 (PyTorch seq-first, batch=1).

    Returns (seq, input_size), matching Music.forward (dropout=None branch).
    """
    seq_len = x.shape[0]
    H = hidden_size
    d_pad = _round_up(input_size, 128)
    x2d = x.reshape(seq_len, input_size).astype(jnp.float32)

    inputs = [x2d] + list(packed_weights)

    kernel = functools.partial(_music_kernel, num_layers, hidden_size, seq_len)
    vmem = pl.BlockSpec(memory_space=pltpu.MemorySpace.VMEM)

    # Explicit VMEM budget: everything is resident (no grid), so size it from
    # the actual arrays with headroom and clamp below v7x's 64 MiB physical.
    weight_bytes = sum(int(w.size) * 4 for w in packed_weights)
    arr_bytes = 4 * (
        seq_len * input_size      # x
        + seq_len * d_pad         # out
        + seq_len * 4 * H         # xproj scratch
        + seq_len * H             # hout scratch
    ) + weight_bytes
    vmem_limit = int(min(max(2 * arr_bytes + (4 << 20), 16 << 20), 64 << 20))

    out = pl.pallas_call(
        kernel,
        out_shape=jax.ShapeDtypeStruct((seq_len, d_pad), jnp.float32),
        in_specs=[vmem] * len(inputs),
        out_specs=vmem,
        scratch_shapes=[
            pltpu.VMEM((seq_len, 4 * H), jnp.float32),  # xproj
            pltpu.VMEM((seq_len, H), jnp.float32),      # per-layer hidden outputs
        ],
        compiler_params=pltpu.CompilerParams(vmem_limit_bytes=vmem_limit),
    )(*inputs)

    if d_pad != input_size:
        out = out[:, :input_size]
    return out


# ----------------------------------------------------------------------------
# Deterministic parameter init (PyTorch-style uniform(-1/sqrt(H), 1/sqrt(H)))
# ----------------------------------------------------------------------------
def init_params(key, input_size, hidden_size, num_layers):
    bound = 1.0 / math.sqrt(hidden_size)
    params = {}
    for l in range(num_layers):
        in_dim = input_size if l == 0 else hidden_size
        key, k1, k2, k3, k4 = jax.random.split(key, 5)
        w_ih = jax.random.uniform(k1, (4 * hidden_size, in_dim), jnp.float32, -bound, bound)
        w_hh = jax.random.uniform(k2, (4 * hidden_size, hidden_size), jnp.float32, -bound, bound)
        b_ih = jax.random.uniform(k3, (4 * hidden_size,), jnp.float32, -bound, bound)
        b_hh = jax.random.uniform(k4, (4 * hidden_size,), jnp.float32, -bound, bound)
        params[f"lstm_l{l}"] = (w_ih, w_hh, b_ih, b_hh)
    key, k1, k2 = jax.random.split(key, 3)
    w_out = jax.random.uniform(k1, (input_size, hidden_size), jnp.float32, -bound, bound)
    b_out = jax.random.uniform(k2, (input_size,), jnp.float32, -bound, bound)
    params["hidden2out"] = (w_out, b_out)
    return params


# ----------------------------------------------------------------------------
# Pure-JAX reference (mirrors PyTorch LSTM + Linear semantics, original order)
# ----------------------------------------------------------------------------
def music_reference(x, params, *, input_size, hidden_size, num_layers):
    seq_len = x.shape[0]
    H = hidden_size
    layer_in = x.reshape(seq_len, input_size)
    for l in range(num_layers):
        w_ih, w_hh, b_ih, b_hh = params[f"lstm_l{l}"]
        h = jnp.zeros((H,), jnp.float32)
        c = jnp.zeros((H,), jnp.float32)
        outs = []
        for t in range(seq_len):
            gates = layer_in[t] @ w_ih.T + b_ih + h @ w_hh.T + b_hh
            i = jax.nn.sigmoid(gates[0 * H:1 * H])
            f = jax.nn.sigmoid(gates[1 * H:2 * H])
            g = jnp.tanh(gates[2 * H:3 * H])
            o = jax.nn.sigmoid(gates[3 * H:4 * H])
            c = f * c + i * g
            h = o * jnp.tanh(c)
            outs.append(h)
        layer_in = jnp.stack(outs, axis=0)
    w_out, b_out = params["hidden2out"]
    return layer_in @ w_out.T + b_out


# TODO(synk): nn.Dropout branch is not exercised (module default dropout=None),
# so it is intentionally omitted from the kernel.

if __name__ == "__main__":
    input_size = 8
    hidden_size = 32
    num_layers = 2
    seq_len = 8

    key = jax.random.PRNGKey(0)
    key, xk = jax.random.split(key)
    params = init_params(key, input_size, hidden_size, num_layers)
    x = jax.random.normal(xk, (seq_len, 1, input_size), jnp.float32)

    packed = prepare_inputs(
        params, input_size=input_size, hidden_size=hidden_size, num_layers=num_layers
    )

    out = music_forward(
        x, packed, input_size=input_size, hidden_size=hidden_size, num_layers=num_layers
    )
    out = jax.block_until_ready(out)

    ref = music_reference(
        x, params, input_size=input_size, hidden_size=hidden_size, num_layers=num_layers
    )
    assert out.shape == (seq_len, input_size)
    assert jnp.allclose(out, ref, rtol=1e-3, atol=1e-3), "mismatch vs JAX reference"
    print("KERNEL_OK")
</pallas_src>

<mosaic_0001>
module attributes {stable_mosaic.version = 11 : i64} {
  func.func @_music_kernel(%arg0: memref<8x8xf32, #tpu.memory_space<vmem>>, %arg1: memref<8x128xf32, #tpu.memory_space<vmem>>, %arg2: memref<32x128xf32, #tpu.memory_space<vmem>>, %arg3: memref<1x128xf32, #tpu.memory_space<vmem>>, %arg4: memref<32x128xf32, #tpu.memory_space<vmem>>, %arg5: memref<32x128xf32, #tpu.memory_space<vmem>>, %arg6: memref<1x128xf32, #tpu.memory_space<vmem>>, %arg7: memref<32x128xf32, #tpu.memory_space<vmem>>, %arg8: memref<1x128xf32, #tpu.memory_space<vmem>>, %arg9: memref<8x128xf32, #tpu.memory_space<vmem>>, %arg10: memref<8x128xf32, #tpu.memory_space<vmem>>, %arg11: memref<8x32xf32, #tpu.memory_space<vmem>>) attributes {dimension_semantics = [], scalar_prefetch = 0 : i64, scratch_operands = 2 : i64, tpu.core_type = #tpu.core_type<tc>} {
    %c0 = arith.constant 0 : index
    %c0_0 = arith.constant 0 : index
    %0 = vector.load %arg0[%c0, %c0_0] : memref<8x8xf32, #tpu.memory_space<vmem>>, vector<8x8xf32>
    %c0_1 = arith.constant 0 : index
    %c0_2 = arith.constant 0 : index
    %1 = vector.load %arg1[%c0_1, %c0_2] : memref<8x128xf32, #tpu.memory_space<vmem>>, vector<8x128xf32>
    %cst = arith.constant dense<0.000000e+00> : vector<8x128xf32>
    %2 = tpu.matmul %0, %1, %cst {dimension_numbers = #tpu.dot_dimension_numbers<[1], [0], [0], [1], [0, 0, 1, 1], [], []>} : vector<8x8xf32>, vector<8x128xf32>, vector<8x128xf32> -> vector<8x128xf32>
    %c0_3 = arith.constant 0 : index
    %c0_4 = arith.constant 0 : index
    %3 = vector.load %arg3[%c0_3, %c0_4] : memref<1x128xf32, #tpu.memory_space<vmem>>, vector<1x128xf32>
    %4 = vector.broadcast %3 : vector<1x128xf32> to vector<8x128xf32>
    %5 = arith.addf %2, %4 : vector<8x128xf32>
    %c0_5 = arith.constant 0 : index
    %c0_6 = arith.constant 0 : index
    %6 = vector.load %arg10[%c0_5, %c0_6] : memref<8x128xf32, #tpu.memory_space<vmem>>, vector<8x128xf32>
    tpu.vector_store %arg10[%c0_5, %c0_6], %5 {strides = array<i32>} : memref<8x128xf32, #tpu.memory_space<vmem>>, vector<8x128xf32>,
    %c0_7 = arith.constant 0 : index
    %c0_8 = arith.constant 0 : index
    %7 = vector.load %arg2[%c0_7, %c0_8] : memref<32x128xf32, #tpu.memory_space<vmem>>, vector<32x128xf32>
    %cst_9 = arith.constant 0.000000e+00 : f32
    %8 = vector.broadcast %cst_9 : f32 to vector<1x32xf32>
    %cst_10 = arith.constant 0.000000e+00 : f32
    %9 = vector.broadcast %cst_10 : f32 to vector<1x32xf32>
    %c0_11 = arith.constant 0 : index
    %c0_12 = arith.constant 0 : index
    %10 = vector.load %arg10[%c0_11, %c0_12] : memref<8x128xf32, #tpu.memory_space<vmem>>, vector<8x128xf32>
    %11 = vector.extract_strided_slice %10 {offsets = [0, 0], sizes = [1, 128], strides = [1, 1]} : vector<8x128xf32> to vector<1x128xf32>
    %cst_13 = arith.constant dense<0.000000e+00> : vector<1x128xf32>
    %12 = tpu.matmul %8, %7, %cst_13 {dimension_numbers = #tpu.dot_dimension_numbers<[1], [0], [0], [1], [0, 0, 1, 1], [], []>} : vector<1x32xf32>, vector<32x128xf32>, vector<1x128xf32> -> vector<1x128xf32>
    %13 = arith.addf %11, %12 : vector<1x128xf32>
    %14 = vector.extract_strided_slice %13 {offsets = [0, 0], sizes = [1, 96], strides = [1, 1]} : vector<1x128xf32> to vector<1x96xf32>
    %15 = arith.negf %14 : vector<1x96xf32>
    %16 = math.exp %15 : vector<1x96xf32>
    %cst_14 = arith.constant 1.000000e+00 : f32
    %17 = vector.broadcast %cst_14 : f32 to vector<1x96xf32>
    %18 = arith.addf %17, %16 : vector<1x96xf32>
    %19 = arith.divf %17, %18 : vector<1x96xf32>
    %20 = vector.extract_strided_slice %13 {offsets = [0, 96], sizes = [1, 32], strides = [1, 1]} : vector<1x128xf32> to vector<1x32xf32>
    %21 = math.tanh %20 : vector<1x32xf32>
    %22 = vector.extract_strided_slice %19 {offsets = [0, 0], sizes = [1, 32], strides = [1, 1]} : vector<1x96xf32> to vector<1x32xf32>
    %23 = vector.extract_strided_slice %19 {offsets = [0, 32], sizes = [1, 32], strides = [1, 1]} : vector<1x96xf32> to vector<1x32xf32>
    %24 = vector.extract_strided_slice %19 {offsets = [0, 64], sizes = [1, 32], strides = [1, 1]} : vector<1x96xf32> to vector<1x32xf32>
    %25 = arith.mulf %23, %9 : vector<1x32xf32>
    %26 = arith.mulf %22, %21 : vector<1x32xf32>
    %27 = arith.addf %25, %26 : vector<1x32xf32>
    %28 = math.tanh %27 : vector<1x32xf32>
    %29 = arith.mulf %24, %28 : vector<1x32xf32>
    %30 = vector.extract_strided_slice %10 {offsets = [1, 0], sizes = [1, 128], strides = [1, 1]} : vector<8x128xf32> to vector<1x128xf32>
    %cst_15 = arith.constant dense<0.000000e+00> : vector<1x128xf32>
    %31 = tpu.matmul %29, %7, %cst_15 {dimension_numbers = #tpu.dot_dimension_numbers<[1], [0], [0], [1], [0, 0, 1, 1], [], []>} : vector<1x32xf32>, vector<32x128xf32>, vector<1x128xf32> -> vector<1x128xf32>
    %32 = arith.addf %30, %31 : vector<1x128xf32>
    %33 = vector.extract_strided_slice %32 {offsets = [0, 0], sizes = [1, 96], strides = [1, 1]} : vector<1x128xf32> to vector<1x96xf32>
    %34 = arith.negf %33 : vector<1x96xf32>
    %35 = math.exp %34 : vector<1x96xf32>
    %cst_16 = arith.constant 1.000000e+00 : f32
    %36 = vector.broadcast %cst_16 : f32 to vector<1x96xf32>
    %37 = arith.addf %36, %35 : vector<1x96xf32>
    %38 = arith.divf %36, %37 : vector<1x96xf32>
    %39 = vector.extract_strided_slice %32 {offsets = [0, 96], sizes = [1, 32], strides = [1, 1]} : vector<1x128xf32> to vector<1x32xf32>
    %40 = math.tanh %39 : vector<1x32xf32>
    %41 = vector.extract_strided_slice %38 {offsets = [0, 0], sizes = [1, 32], strides = [1, 1]} : vector<1x96xf32> to vector<1x32xf32>
    %42 = vector.extract_strided_slice %38 {offsets = [0, 32], sizes = [1, 32], strides = [1, 1]} : vector<1x96xf32> to vector<1x32xf32>
    %43 = vector.extract_strided_slice %38 {offsets = [0, 64], sizes = [1, 32], strides = [1, 1]} : vector<1x96xf32> to vector<1x32xf32>
    %44 = arith.mulf %42, %27 : vector<1x32xf32>
    %45 = arith.mulf %41, %40 : vector<1x32xf32>
    %46 = arith.addf %44, %45 : vector<1x32xf32>
    %47 = math.tanh %46 : vector<1x32xf32>
    %48 = arith.mulf %43, %47 : vector<1x32xf32>
    %49 = vector.extract_strided_slice %10 {offsets = [2, 0], sizes = [1, 128], strides = [1, 1]} : vector<8x128xf32> to vector<1x128xf32>
    %cst_17 = arith.constant dense<0.000000e+00> : vector<1x128xf32>
    %50 = tpu.matmul %48, %7, %cst_17 {dimension_numbers = #tpu.dot_dimension_numbers<[1], [0], [0], [1], [0, 0, 1, 1], [], []>} : vector<1x32xf32>, vector<32x128xf32>, vector<1x128xf32> -> vector<1x128xf32>
    %51 = arith.addf %49, %50 : vector<1x128xf32>
    %52 = vector.extract_strided_slice %51 {offsets = [0, 0], sizes = [1, 96], strides = [1, 1]} : vector<1x128xf32> to vector<1x96xf32>
    %53 = arith.negf %52 : vector<1x96xf32>
    %54 = math.exp %53 : vector<1x96xf32>
    %cst_18 = arith.constant 1.000000e+00 : f32
    %55 = vector.broadcast %cst_18 : f32 to vector<1x96xf32>
    %56 = arith.addf %55, %54 : vector<1x96xf32>
    %57 = arith.divf %55, %56 : vector<1x96xf32>
    %58 = vector.extract_strided_slice %51 {offsets = [0, 96], sizes = [1, 32], strides = [1, 1]} : vector<1x128xf32> to vector<1x32xf32>
    %59 = math.tanh %58 : vector<1x32xf32>
    %60 = vector.extract_strided_slice %57 {offsets = [0, 0], sizes = [1, 32], strides = [1, 1]} : vector<1x96xf32> to vector<1x32xf32>
    %61 = vector.extract_strided_slice %57 {offsets = [0, 32], sizes = [1, 32], strides = [1, 1]} : vector<1x96xf32> to vector<1x32xf32>
    %62 = vector.extract_strided_slice %57 {offsets = [0, 64], sizes = [1, 32], strides = [1, 1]} : vector<1x96xf32> to vector<1x32xf32>
    %63 = arith.mulf %61, %46 : vector<1x32xf32>
    %64 = arith.mulf %60, %59 : vector<1x32xf32>
    %65 = arith.addf %63, %64 : vector<1x32xf32>
    %66 = math.tanh %65 : vector<1x32xf32>
    %67 = arith.mulf %62, %66 : vector<1x32xf32>
    %68 = vector.extract_strided_slice %10 {offsets = [3, 0], sizes = [1, 128], strides = [1, 1]} : vector<8x128xf32> to vector<1x128xf32>
    %cst_19 = arith.constant dense<0.000000e+00> : vector<1x128xf32>
    %69 = tpu.matmul %67, %7, %cst_19 {dimension_numbers = #tpu.dot_dimension_numbers<[1], [0], [0], [1], [0, 0, 1, 1], [], []>} : vector<1x32xf32>, vector<32x128xf32>, vector<1x128xf32> -> vector<1x128xf32>
    %70 = arith.addf %68, %69 : vector<1x128xf32>
    %71 = vector.extract_strided_slice %70 {offsets = [0, 0], sizes = [1, 96], strides = [1, 1]} : vector<1x128xf32> to vector<1x96xf32>
    %72 = arith.negf %71 : vector<1x96xf32>
    %73 = math.exp %72 : vector<1x96xf32>
    %cst_20 = arith.constant 1.000000e+00 : f32
    %74 = vector.broadcast %cst_20 : f32 to vector<1x96xf32>
    %75 = arith.addf %74, %73 : vector<1x96xf32>
    %76 = arith.divf %74, %75 : vector<1x96xf32>
    %77 = vector.extract_strided_slice %70 {offsets = [0, 96], sizes = [1, 32], strides = [1, 1]} : vector<1x128xf32> to vector<1x32xf32>
    %78 = math.tanh %77 : vector<1x32xf32>
    %79 = vector.extract_strided_slice %76 {offsets = [0, 0], sizes = [1, 32], strides = [1, 1]} : vector<1x96xf32> to vector<1x32xf32>
    %80 = vector.extract_strided_slice %76 {offsets = [0, 32], sizes = [1, 32], strides = [1, 1]} : vector<1x96xf32> to vector<1x32xf32>
    %81 = vector.extract_strided_slice %76 {offsets = [0, 64], sizes = [1, 32], strides = [1, 1]} : vector<1x96xf32> to vector<1x32xf32>
    %82 = arith.mulf %80, %65 : vector<1x32xf32>
    %83 = arith.mulf %79, %78 : vector<1x32xf32>
    %84 = arith.addf %82, %83 : vector<1x32xf32>
    %85 = math.tanh %84 : vector<1x32xf32>
    %86 = arith.mulf %81, %85 : vector<1x32xf32>
    %87 = vector.extract_strided_slice %10 {offsets = [4, 0], sizes = [1, 128], strides = [1, 1]} : vector<8x128xf32> to vector<1x128xf32>
    %cst_21 = arith.constant dense<0.000000e+00> : vector<1x128xf32>
    %88 = tpu.matmul %86, %7, %cst_21 {dimension_numbers = #tpu.dot_dimension_numbers<[1], [0], [0], [1], [0, 0, 1, 1], [], []>} : vector<1x32xf32>, vector<32x128xf32>, vector<1x128xf32> -> vector<1x128xf32>
    %89 = arith.addf %87, %88 : vector<1x128xf32>
    %90 = vector.extract_strided_slice %89 {offsets = [0, 0], sizes = [1, 96], strides = [1, 1]} : vector<1x128xf32> to vector<1x96xf32>
    %91 = arith.negf %90 : vector<1x96xf32>
    %92 = math.exp %91 : vector<1x96xf32>
    %cst_22 = arith.constant 1.000000e+00 : f32
    %93 = vector.broadcast %cst_22 : f32 to vector<1x96xf32>
    %94 = arith.addf %93, %92 : vector<1x96xf32>
    %95 = arith.divf %93, %94 : vector<1x96xf32>
    %96 = vector.extract_strided_slice %89 {offsets = [0, 96], sizes = [1, 32], strides = [1, 1]} : vector<1x128xf32> to vector<1x32xf32>
    %97 = math.tanh %96 : vector<1x32xf32>
    %98 = vector.extract_strided_slice %95 {offsets = [0, 0], sizes = [1, 32], strides = [1, 1]} : vector<1x96xf32> to vector<1x32xf32>
    %99 = vector.extract_strided_slice %95 {offsets = [0, 32], sizes = [1, 32], strides = [1, 1]} : vector<1x96xf32> to vector<1x32xf32>
    %100 = vector.extract_strided_slice %95 {offsets = [0, 64], sizes = [1, 32], strides = [1, 1]} : vector<1x96xf32> to vector<1x32xf32>
    %101 = arith.mulf %99, %84 : vector<1x32xf32>
    %102 = arith.mulf %98, %97 : vector<1x32xf32>
    %103 = arith.addf %101, %102 : vector<1x32xf32>
    %104 = math.tanh %103 : vector<1x32xf32>
    %105 = arith.mulf %100, %104 : vector<1x32xf32>
    %106 = vector.extract_strided_slice %10 {offsets = [5, 0], sizes = [1, 128], strides = [1, 1]} : vector<8x128xf32> to vector<1x128xf32>
    %cst_23 = arith.constant dense<0.000000e+00> : vector<1x128xf32>
    %107 = tpu.matmul %105, %7, %cst_23 {dimension_numbers = #tpu.dot_dimension_numbers<[1], [0], [0], [1], [0, 0, 1, 1], [], []>} : vector<1x32xf32>, vector<32x128xf32>, vector<1x128xf32> -> vector<1x128xf32>
    %108 = arith.addf %106, %107 : vector<1x128xf32>
    %109 = vector.extract_strided_slice %108 {offsets = [0, 0], sizes = [1, 96], strides = [1, 1]} : vector<1x128xf32> to vector<1x96xf32>
    %110 = arith.negf %109 : vector<1x96xf32>
    %111 = math.exp %110 : vector<1x96xf32>
    %cst_24 = arith.constant 1.000000e+00 : f32
    %112 = vector.broadcast %cst_24 : f32 to vector<1x96xf32>
    %113 = arith.addf %112, %111 : vector<1x96xf32>
    %114 = arith.divf %112, %113 : vector<1x96xf32>
    %115 = vector.extract_strided_slice %108 {offsets = [0, 96], sizes = [1, 32], strides = [1, 1]} : vector<1x128xf32> to vector<1x32xf32>
    %116 = math.tanh %115 : vector<1x32xf32>
    %117 = vector.extract_strided_slice %114 {offsets = [0, 0], sizes = [1, 32], strides = [1, 1]} : vector<1x96xf32> to vector<1x32xf32>
    %118 = vector.extract_strided_slice %114 {offsets = [0, 32], sizes = [1, 32], strides = [1, 1]} : vector<1x96xf32> to vector<1x32xf32>
    %119 = vector.extract_strided_slice %114 {offsets = [0, 64], sizes = [1, 32], strides = [1, 1]} : vector<1x96xf32> to vector<1x32xf32>
    %120 = arith.mulf %118, %103 : vector<1x32xf32>
    %121 = arith.mulf %117, %116 : vector<1x32xf32>
    %122 = arith.addf %120, %121 : vector<1x32xf32>
    %123 = math.tanh %122 : vector<1x32xf32>
    %124 = arith.mulf %119, %123 : vector<1x32xf32>
    %125 = vector.extract_strided_slice %10 {offsets = [6, 0], sizes = [1, 128], strides = [1, 1]} : vector<8x128xf32> to vector<1x128xf32>
    %cst_25 = arith.constant dense<0.000000e+00> : vector<1x128xf32>
    %126 = tpu.matmul %124, %7, %cst_25 {dimension_numbers = #tpu.dot_dimension_numbers<[1], [0], [0], [1], [0, 0, 1, 1], [], []>} : vector<1x32xf32>, vector<32x128xf32>, vector<1x128xf32> -> vector<1x128xf32>
    %127 = arith.addf %125, %126 : vector<1x128xf32>
    %128 = vector.extract_strided_slice %127 {offsets = [0, 0], sizes = [1, 96], strides = [1, 1]} : vector<1x128xf32> to vector<1x96xf32>
    %129 = arith.negf %128 : vector<1x96xf32>
    %130 = math.exp %129 : vector<1x96xf32>
    %cst_26 = arith.constant 1.000000e+00 : f32
    %131 = vector.broadcast %cst_26 : f32 to vector<1x96xf32>
    %132 = arith.addf %131, %130 : vector<1x96xf32>
    %133 = arith.divf %131, %132 : vector<1x96xf32>
    %134 = vector.extract_strided_slice %127 {offsets = [0, 96], sizes = [1, 32], strides = [1, 1]} : vector<1x128xf32> to vector<1x32xf32>
    %135 = math.tanh %134 : vector<1x32xf32>
    %136 = vector.extract_strided_slice %133 {offsets = [0, 0], sizes = [1, 32], strides = [1, 1]} : vector<1x96xf32> to vector<1x32xf32>
    %137 = vector.extract_strided_slice %133 {offsets = [0, 32], sizes = [1, 32], strides = [1, 1]} : vector<1x96xf32> to vector<1x32xf32>
    %138 = vector.extract_strided_slice %133 {offsets = [0, 64], sizes = [1, 32], strides = [1, 1]} : vector<1x96xf32> to vector<1x32xf32>
    %139 = arith.mulf %137, %122 : vector<1x32xf32>
    %140 = arith.mulf %136, %135 : vector<1x32xf32>
    %141 = arith.addf %139, %140 : vector<1x32xf32>
    %142 = math.tanh %141 : vector<1x32xf32>
    %143 = arith.mulf %138, %142 : vector<1x32xf32>
    %144 = vector.extract_strided_slice %10 {offsets = [7, 0], sizes = [1, 128], strides = [1, 1]} : vector<8x128xf32> to vector<1x128xf32>
    %cst_27 = arith.constant dense<0.000000e+00> : vector<1x128xf32>
    %145 = tpu.matmul %143, %7, %cst_27 {dimension_numbers = #tpu.dot_dimension_numbers<[1], [0], [0], [1], [0, 0, 1, 1], [], []>} : vector<1x32xf32>, vector<32x128xf32>, vector<1x128xf32> -> vector<1x128xf32>
    %146 = arith.addf %144, %145 : vector<1x128xf32>
    %147 = vector.extract_strided_slice %146 {offsets = [0, 0], sizes = [1, 96], strides = [1, 1]} : vector<1x128xf32> to vector<1x96xf32>
    %148 = arith.negf %147 : vector<1x96xf32>
    %149 = math.exp %148 : vector<1x96xf32>
    %cst_28 = arith.constant 1.000000e+00 : f32
    %150 = vector.broadcast %cst_28 : f32 to vector<1x96xf32>
    %151 = arith.addf %150, %149 : vector<1x96xf32>
    %152 = arith.divf %150, %151 : vector<1x96xf32>
    %153 = vector.extract_strided_slice %146 {offsets = [0, 96], sizes = [1, 32], strides = [1, 1]} : vector<1x128xf32> to vector<1x32xf32>
    %154 = math.tanh %153 : vector<1x32xf32>
    %155 = vector.extract_strided_slice %152 {offsets = [0, 0], sizes = [1, 32], strides = [1, 1]} : vector<1x96xf32> to vector<1x32xf32>
    %156 = vector.extract_strided_slice %152 {offsets = [0, 32], sizes = [1, 32], strides = [1, 1]} : vector<1x96xf32> to vector<1x32xf32>
    %157 = vector.extract_strided_slice %152 {offsets = [0, 64], sizes = [1, 32], strides = [1, 1]} : vector<1x96xf32> to vector<1x32xf32>
    %158 = arith.mulf %156, %141 : vector<1x32xf32>
    %159 = arith.mulf %155, %154 : vector<1x32xf32>
    %160 = arith.addf %158, %159 : vector<1x32xf32>
    %161 = math.tanh %160 : vector<1x32xf32>
    %162 = arith.mulf %157, %161 : vector<1x32xf32>
    %163 = tpu.concatenate %29, %48, %67, %86, %105, %124, %143, %162 in 0 : vector<1x32xf32>, vector<1x32xf32>, vector<1x32xf32>, vector<1x32xf32>, vector<1x32xf32>, vector<1x32xf32>, vector<1x32xf32>, vector<1x32xf32> -> vector<8x32xf32>
    %c0_29 = arith.constant 0 : index
    %c0_30 = arith.constant 0 : index
    %164 = vector.load %arg11[%c0_29, %c0_30] : memref<8x32xf32, #tpu.memory_space<vmem>>, vector<8x32xf32>
    tpu.vector_store %arg11[%c0_29, %c0_30], %163 {strides = array<i32>} : memref<8x32xf32, #tpu.memory_space<vmem>>, vector<8x32xf32>,
    %c0_31 = arith.constant 0 : index
    %c0_32 = arith.constant 0 : index
    %165 = vector.load %arg11[%c0_31, %c0_32] : memref<8x32xf32, #tpu.memory_space<vmem>>, vector<8x32xf32>
    %c0_33 = arith.constant 0 : index
    %c0_34 = arith.constant 0 : index
    %166 = vector.load %arg4[%c0_33, %c0_34] : memref<32x128xf32, #tpu.memory_space<vmem>>, vector<32x128xf32>
    %cst_35 = arith.constant dense<0.000000e+00> : vector<8x128xf32>
    %167 = tpu.matmul %165, %166, %cst_35 {dimension_numbers = #tpu.dot_dimension_numbers<[1], [0], [0], [1], [0, 0, 1, 1], [], []>} : vector<8x32xf32>, vector<32x128xf32>, vector<8x128xf32> -> vector<8x128xf32>
    %c0_36 = arith.constant 0 : index
    %c0_37 = arith.constant 0 : index
    %168 = vector.load %arg6[%c0_36, %c0_37] : memref<1x128xf32, #tpu.memory_space<vmem>>, vector<1x128xf32>
    %169 = vector.broadcast %168 : vector<1x128xf32> to vector<8x128xf32>
    %170 = arith.addf %167, %169 : vector<8x128xf32>
    %c0_38 = arith.constant 0 : index
    %c0_39 = arith.constant 0 : index
    %171 = vector.load %arg10[%c0_38, %c0_39] : memref<8x128xf32, #tpu.memory_space<vmem>>, vector<8x128xf32>
    tpu.vector_store %arg10[%c0_38, %c0_39], %170 {strides = array<i32>} : memref<8x128xf32, #tpu.memory_space<vmem>>, vector<8x128xf32>,
    %c0_40 = arith.constant 0 : index
    %c0_41 = arith.constant 0 : index
    %172 = vector.load %arg5[%c0_40, %c0_41] : memref<32x128xf32, #tpu.memory_space<vmem>>, vector<32x128xf32>
    %cst_42 = arith.constant 0.000000e+00 : f32
    %173 = vector.broadcast %cst_42 : f32 to vector<1x32xf32>
    %cst_43 = arith.constant 0.000000e+00 : f32
    %174 = vector.broadcast %cst_43 : f32 to vector<1x32xf32>
    %c0_44 = arith.constant 0 : index
    %c0_45 = arith.constant 0 : index
    %175 = vector.load %arg10[%c0_44, %c0_45] : memref<8x128xf32, #tpu.memory_space<vmem>>, vector<8x128xf32>
    %176 = vector.extract_strided_slice %175 {offsets = [0, 0], sizes = [1, 128], strides = [1, 1]} : vector<8x128xf32> to vector<1x128xf32>
    %cst_46 = arith.constant dense<0.000000e+00> : vector<1x128xf32>
    %177 = tpu.matmul %173, %172, %cst_46 {dimension_numbers = #tpu.dot_dimension_numbers<[1], [0], [0], [1], [0, 0, 1, 1], [], []>} : vector<1x32xf32>, vector<32x128xf32>, vector<1x128xf32> -> vector<1x128xf32>
    %178 = arith.addf %176, %177 : vector<1x128xf32>
    %179 = vector.extract_strided_slice %178 {offsets = [0, 0], sizes = [1, 96], strides = [1, 1]} : vector<1x128xf32> to vector<1x96xf32>
    %180 = arith.negf %179 : vector<1x96xf32>
    %181 = math.exp %180 : vector<1x96xf32>
    %cst_47 = arith.constant 1.000000e+00 : f32
    %182 = vector.broadcast %cst_47 : f32 to vector<1x96xf32>
    %183 = arith.addf %182, %181 : vector<1x96xf32>
    %184 = arith.divf %182, %183 : vector<1x96xf32>
    %185 = vector.extract_strided_slice %178 {offsets = [0, 96], sizes = [1, 32], strides = [1, 1]} : vector<1x128xf32> to vector<1x32xf32>
    %186 = math.tanh %185 : vector<1x32xf32>
    %187 = vector.extract_strided_slice %184 {offsets = [0, 0], sizes = [1, 32], strides = [1, 1]} : vector<1x96xf32> to vector<1x32xf32>
    %188 = vector.extract_strided_slice %184 {offsets = [0, 32], sizes = [1, 32], strides = [1, 1]} : vector<1x96xf32> to vector<1x32xf32>
    %189 = vector.extract_strided_slice %184 {offsets = [0, 64], sizes = [1, 32], strides = [1, 1]} : vector<1x96xf32> to vector<1x32xf32>
    %190 = arith.mulf %188, %174 : vector<1x32xf32>
    %191 = arith.mulf %187, %186 : vector<1x32xf32>
    %192 = arith.addf %190, %191 : vector<1x32xf32>
    %193 = math.tanh %192 : vector<1x32xf32>
    %194 = arith.mulf %189, %193 : vector<1x32xf32>
    %195 = vector.extract_strided_slice %175 {offsets = [1, 0], sizes = [1, 128], strides = [1, 1]} : vector<8x128xf32> to vector<1x128xf32>
    %cst_48 = arith.constant dense<0.000000e+00> : vector<1x128xf32>
    %196 = tpu.matmul %194, %172, %cst_48 {dimension_numbers = #tpu.dot_dimension_numbers<[1], [0], [0], [1], [0, 0, 1, 1], [], []>} : vector<1x32xf32>, vector<32x128xf32>, vector<1x128xf32> -> vector<1x128xf32>
    %197 = arith.addf %195, %196 : vector<1x128xf32>
    %198 = vector.extract_strided_slice %197 {offsets = [0, 0], sizes = [1, 96], strides = [1, 1]} : vector<1x128xf32> to vector<1x96xf32>
    %199 = arith.negf %198 : vector<1x96xf32>
    %200 = math.exp %199 : vector<1x96xf32>
    %cst_49 = arith.constant 1.000000e+00 : f32
    %201 = vector.broadcast %cst_49 : f32 to vector<1x96xf32>
    %202 = arith.addf %201, %200 : vector<1x96xf32>
    %203 = arith.divf %201, %202 : vector<1x96xf32>
    %204 = vector.extract_strided_slice %197 {offsets = [0, 96], sizes = [1, 32], strides = [1, 1]} : vector<1x128xf32> to vector<1x32xf32>
    %205 = math.tanh %204 : vector<1x32xf32>
    %206 = vector.extract_strided_slice %203 {offsets = [0, 0], sizes = [1, 32], strides = [1, 1]} : vector<1x96xf32> to vector<1x32xf32>
    %207 = vector.extract_strided_slice %203 {offsets = [0, 32], sizes = [1, 32], strides = [1, 1]} : vector<1x96xf32> to vector<1x32xf32>
    %208 = vector.extract_strided_slice %203 {offsets = [0, 64], sizes = [1, 32], strides = [1, 1]} : vector<1x96xf32> to vector<1x32xf32>
    %209 = arith.mulf %207, %192 : vector<1x32xf32>
    %210 = arith.mulf %206, %205 : vector<1x32xf32>
    %211 = arith.addf %209, %210 : vector<1x32xf32>
    %212 = math.tanh %211 : vector<1x32xf32>
    %213 = arith.mulf %208, %212 : vector<1x32xf32>
    %214 = vector.extract_strided_slice %175 {offsets = [2, 0], sizes = [1, 128], strides = [1, 1]} : vector<8x128xf32> to vector<1x128xf32>
    %cst_50 = arith.constant dense<0.000000e+00> : vector<1x128xf32>
    %215 = tpu.matmul %213, %172, %cst_50 {dimension_numbers = #tpu.dot_dimension_numbers<[1], [0], [0], [1], [0, 0, 1, 1], [], []>} : vector<1x32xf32>, vector<32x128xf32>, vector<1x128xf32> -> vector<1x128xf32>
    %216 = arith.addf %214, %215 : vector<1x128xf32>
    %217 = vector.extract_strided_slice %216 {offsets = [0, 0], sizes = [1, 96], strides = [1, 1]} : vector<1x128xf32> to vector<1x96xf32>
    %218 = arith.negf %217 : vector<1x96xf32>
    %219 = math.exp %218 : vector<1x96xf32>
    %cst_51 = arith.constant 1.000000e+00 : f32
    %220 = vector.broadcast %cst_51 : f32 to vector<1x96xf32>
    %221 = arith.addf %220, %219 : vector<1x96xf32>
    %222 = arith.divf %220, %221 : vector<1x96xf32>
    %223 = vector.extract_strided_slice %216 {offsets = [0, 96], sizes = [1, 32], strides = [1, 1]} : vector<1x128xf32> to vector<1x32xf32>
    %224 = math.tanh %223 : vector<1x32xf32>
    %225 = vector.extract_strided_slice %222 {offsets = [0, 0], sizes = [1, 32], strides = [1, 1]} : vector<1x96xf32> to vector<1x32xf32>
    %226 = vector.extract_strided_slice %222 {offsets = [0, 32], sizes = [1, 32], strides = [1, 1]} : vector<1x96xf32> to vector<1x32xf32>
    %227 = vector.extract_strided_slice %222 {offsets = [0, 64], sizes = [1, 32], strides = [1, 1]} : vector<1x96xf32> to vector<1x32xf32>
    %228 = arith.mulf %226, %211 : vector<1x32xf32>
    %229 = arith.mulf %225, %224 : vector<1x32xf32>
    %230 = arith.addf %228, %229 : vector<1x32xf32>
    %231 = math.tanh %230 : vector<1x32xf32>
    %232 = arith.mulf %227, %231 : vector<1x32xf32>
    %233 = vector.extract_strided_slice %175 {offsets = [3, 0], sizes = [1, 128], strides = [1, 1]} : vector<8x128xf32> to vector<1x128xf32>
    %cst_52 = arith.constant dense<0.000000e+00> : vector<1x128xf32>
    %234 = tpu.matmul %232, %172, %cst_52 {dimension_numbers = #tpu.dot_dimension_numbers<[1], [0], [0], [1], [0, 0, 1, 1], [], []>} : vector<1x32xf32>, vector<32x128xf32>, vector<1x128xf32> -> vector<1x128xf32>
    %235 = arith.addf %233, %234 : vector<1x128xf32>
    %236 = vector.extract_strided_slice %235 {offsets = [0, 0], sizes = [1, 96], strides = [1, 1]} : vector<1x128xf32> to vector<1x96xf32>
    %237 = arith.negf %236 : vector<1x96xf32>
    %238 = math.exp %237 : vector<1x96xf32>
    %cst_53 = arith.constant 1.000000e+00 : f32
    %239 = vector.broadcast %cst_53 : f32 to vector<1x96xf32>
    %240 = arith.addf %239, %238 : vector<1x96xf32>
    %241 = arith.divf %239, %240 : vector<1x96xf32>
    %242 = vector.extract_strided_slice %235 {offsets = [0, 96], sizes = [1, 32], strides = [1, 1]} : vector<1x128xf32> to vector<1x32xf32>
    %243 = math.tanh %242 : vector<1x32xf32>
    %244 = vector.extract_strided_slice %241 {offsets = [0, 0], sizes = [1, 32], strides = [1, 1]} : vector<1x96xf32> to vector<1x32xf32>
    %245 = vector.extract_strided_slice %241 {offsets = [0, 32], sizes = [1, 32], strides = [1, 1]} : vector<1x96xf32> to vector<1x32xf32>
    %246 = vector.extract_strided_slice %241 {offsets = [0, 64], sizes = [1, 32], strides = [1, 1]} : vector<1x96xf32> to vector<1x32xf32>
    %247 = arith.mulf %245, %230 : vector<1x32xf32>
    %248 = arith.mulf %244, %243 : vector<1x32xf32>
    %249 = arith.addf %247, %248 : vector<1x32xf32>
    %250 = math.tanh %249 : vector<1x32xf32>
    %251 = arith.mulf %246, %250 : vector<1x32xf32>
    %252 = vector.extract_strided_slice %175 {offsets = [4, 0], sizes = [1, 128], strides = [1, 1]} : vector<8x128xf32> to vector<1x128xf32>
    %cst_54 = arith.constant dense<0.000000e+00> : vector<1x128xf32>
    %253 = tpu.matmul %251, %172, %cst_54 {dimension_numbers = #tpu.dot_dimension_numbers<[1], [0], [0], [1], [0, 0, 1, 1], [], []>} : vector<1x32xf32>, vector<32x128xf32>, vector<1x128xf32> -> vector<1x128xf32>
    %254 = arith.addf %252, %253 : vector<1x128xf32>
    %255 = vector.extract_strided_slice %254 {offsets = [0, 0], sizes = [1, 96], strides = [1, 1]} : vector<1x128xf32> to vector<1x96xf32>
    %256 = arith.negf %255 : vector<1x96xf32>
    %257 = math.exp %256 : vector<1x96xf32>
    %cst_55 = arith.constant 1.000000e+00 : f32
    %258 = vector.broadcast %cst_55 : f32 to vector<1x96xf32>
    %259 = arith.addf %258, %257 : vector<1x96xf32>
    %260 = arith.divf %258, %259 : vector<1x96xf32>
    %261 = vector.extract_strided_slice %254 {offsets = [0, 96], sizes = [1, 32], strides = [1, 1]} : vector<1x128xf32> to vector<1x32xf32>
    %262 = math.tanh %261 : vector<1x32xf32>
    %263 = vector.extract_strided_slice %260 {offsets = [0, 0], sizes = [1, 32], strides = [1, 1]} : vector<1x96xf32> to vector<1x32xf32>
    %264 = vector.extract_strided_slice %260 {offsets = [0, 32], sizes = [1, 32], strides = [1, 1]} : vector<1x96xf32> to vector<1x32xf32>
    %265 = vector.extract_strided_slice %260 {offsets = [0, 64], sizes = [1, 32], strides = [1, 1]} : vector<1x96xf32> to vector<1x32xf32>
    %266 = arith.mulf %264, %249 : vector<1x32xf32>
    %267 = arith.mulf %263, %262 : vector<1x32xf32>
    %268 = arith.addf %266, %267 : vector<1x32xf32>
    %269 = math.tanh %268 : vector<1x32xf32>
    %270 = arith.mulf %265, %269 : vector<1x32xf32>
    %271 = vector.extract_strided_slice %175 {offsets = [5, 0], sizes = [1, 128], strides = [1, 1]} : vector<8x128xf32> to vector<1x128xf32>
    %cst_56 = arith.constant dense<0.000000e+00> : vector<1x128xf32>
    %272 = tpu.matmul %270, %172, %cst_56 {dimension_numbers = #tpu.dot_dimension_numbers<[1], [0], [0], [1], [0, 0, 1, 1], [], []>} : vector<1x32xf32>, vector<32x128xf32>, vector<1x128xf32> -> vector<1x128xf32>
    %273 = arith.addf %271, %272 : vector<1x128xf32>
    %274 = vector.extract_strided_slice %273 {offsets = [0, 0], sizes = [1, 96], strides = [1, 1]} : vector<1x128xf32> to vector<1x96xf32>
    %275 = arith.negf %274 : vector<1x96xf32>
    %276 = math.exp %275 : vector<1x96xf32>
    %cst_57 = arith.constant 1.000000e+00 : f32
    %277 = vector.broadcast %cst_57 : f32 to vector<1x96xf32>
    %278 = arith.addf %277, %276 : vector<1x96xf32>
    %279 = arith.divf %277, %278 : vector<1x96xf32>
    %280 = vector.extract_strided_slice %273 {offsets = [0, 96], sizes = [1, 32], strides = [1, 1]} : vector<1x128xf32> to vector<1x32xf32>
    %281 = math.tanh %280 : vector<1x32xf32>
    %282 = vector.extract_strided_slice %279 {offsets = [0, 0], sizes = [1, 32], strides = [1, 1]} : vector<1x96xf32> to vector<1x32xf32>
    %283 = vector.extract_strided_slice %279 {offsets = [0, 32], sizes = [1, 32], strides = [1, 1]} : vector<1x96xf32> to vector<1x32xf32>
    %284 = vector.extract_strided_slice %279 {offsets = [0, 64], sizes = [1, 32], strides = [1, 1]} : vector<1x96xf32> to vector<1x32xf32>
    %285 = arith.mulf %283, %268 : vector<1x32xf32>
    %286 = arith.mulf %282, %281 : vector<1x32xf32>
    %287 = arith.addf %285, %286 : vector<1x32xf32>
    %288 = math.tanh %287 : vector<1x32xf32>
    %289 = arith.mulf %284, %288 : vector<1x32xf32>
    %290 = vector.extract_strided_slice %175 {offsets = [6, 0], sizes = [1, 128], strides = [1, 1]} : vector<8x128xf32> to vector<1x128xf32>
    %cst_58 = arith.constant dense<0.000000e+00> : vector<1x128xf32>
    %291 = tpu.matmul %289, %172, %cst_58 {dimension_numbers = #tpu.dot_dimension_numbers<[1], [0], [0], [1], [0, 0, 1, 1], [], []>} : vector<1x32xf32>, vector<32x128xf32>, vector<1x128xf32> -> vector<1x128xf32>
    %292 = arith.addf %290, %291 : vector<1x128xf32>
    %293 = vector.extract_strided_slice %292 {offsets = [0, 0], sizes = [1, 96], strides = [1, 1]} : vector<1x128xf32> to vector<1x96xf32>
    %294 = arith.negf %293 : vector<1x96xf32>
    %295 = math.exp %294 : vector<1x96xf32>
    %cst_59 = arith.constant 1.000000e+00 : f32
    %296 = vector.broadcast %cst_59 : f32 to vector<1x96xf32>
    %297 = arith.addf %296, %295 : vector<1x96xf32>
    %298 = arith.divf %296, %297 : vector<1x96xf32>
    %299 = vector.extract_strided_slice %292 {offsets = [0, 96], sizes = [1, 32], strides = [1, 1]} : vector<1x128xf32> to vector<1x32xf32>
    %300 = math.tanh %299 : vector<1x32xf32>
    %301 = vector.extract_strided_slice %298 {offsets = [0, 0], sizes = [1, 32], strides = [1, 1]} : vector<1x96xf32> to vector<1x32xf32>
    %302 = vector.extract_strided_slice %298 {offsets = [0, 32], sizes = [1, 32], strides = [1, 1]} : vector<1x96xf32> to vector<1x32xf32>
    %303 = vector.extract_strided_slice %298 {offsets = [0, 64], sizes = [1, 32], strides = [1, 1]} : vector<1x96xf32> to vector<1x32xf32>
    %304 = arith.mulf %302, %287 : vector<1x32xf32>
    %305 = arith.mulf %301, %300 : vector<1x32xf32>
    %306 = arith.addf %304, %305 : vector<1x32xf32>
    %307 = math.tanh %306 : vector<1x32xf32>
    %308 = arith.mulf %303, %307 : vector<1x32xf32>
    %309 = vector.extract_strided_slice %175 {offsets = [7, 0], sizes = [1, 128], strides = [1, 1]} : vector<8x128xf32> to vector<1x128xf32>
    %cst_60 = arith.constant dense<0.000000e+00> : vector<1x128xf32>
    %310 = tpu.matmul %308, %172, %cst_60 {dimension_numbers = #tpu.dot_dimension_numbers<[1], [0], [0], [1], [0, 0, 1, 1], [], []>} : vector<1x32xf32>, vector<32x128xf32>, vector<1x128xf32> -> vector<1x128xf32>
    %311 = arith.addf %309, %310 : vector<1x128xf32>
    %312 = vector.extract_strided_slice %311 {offsets = [0, 0], sizes = [1, 96], strides = [1, 1]} : vector<1x128xf32> to vector<1x96xf32>
    %313 = arith.negf %312 : vector<1x96xf32>
    %314 = math.exp %313 : vector<1x96xf32>
    %cst_61 = arith.constant 1.000000e+00 : f32
    %315 = vector.broadcast %cst_61 : f32 to vector<1x96xf32>
    %316 = arith.addf %315, %314 : vector<1x96xf32>
    %317 = arith.divf %315, %316 : vector<1x96xf32>
    %318 = vector.extract_strided_slice %311 {offsets = [0, 96], sizes = [1, 32], strides = [1, 1]} : vector<1x128xf32> to vector<1x32xf32>
    %319 = math.tanh %318 : vector<1x32xf32>
    %320 = vector.extract_strided_slice %317 {offsets = [0, 0], sizes = [1, 32], strides = [1, 1]} : vector<1x96xf32> to vector<1x32xf32>
    %321 = vector.extract_strided_slice %317 {offsets = [0, 32], sizes = [1, 32], strides = [1, 1]} : vector<1x96xf32> to vector<1x32xf32>
    %322 = vector.extract_strided_slice %317 {offsets = [0, 64], sizes = [1, 32], strides = [1, 1]} : vector<1x96xf32> to vector<1x32xf32>
    %323 = arith.mulf %321, %306 : vector<1x32xf32>
    %324 = arith.mulf %320, %319 : vector<1x32xf32>
    %325 = arith.addf %323, %324 : vector<1x32xf32>
    %326 = math.tanh %325 : vector<1x32xf32>
    %327 = arith.mulf %322, %326 : vector<1x32xf32>
    %328 = tpu.concatenate %194, %213, %232, %251, %270, %289, %308, %327 in 0 : vector<1x32xf32>, vector<1x32xf32>, vector<1x32xf32>, vector<1x32xf32>, vector<1x32xf32>, vector<1x32xf32>, vector<1x32xf32>, vector<1x32xf32> -> vector<8x32xf32>
    %c0_62 = arith.constant 0 : index
    %c0_63 = arith.constant 0 : index
    %329 = vector.load %arg11[%c0_62, %c0_63] : memref<8x32xf32, #tpu.memory_space<vmem>>, vector<8x32xf32>
    tpu.vector_store %arg11[%c0_62, %c0_63], %328 {strides = array<i32>} : memref<8x32xf32, #tpu.memory_space<vmem>>, vector<8x32xf32>,
    %c0_64 = arith.constant 0 : index
    %c0_65 = arith.constant 0 : index
    %330 = vector.load %arg11[%c0_64, %c0_65] : memref<8x32xf32, #tpu.memory_space<vmem>>, vector<8x32xf32>
    %c0_66 = arith.constant 0 : index
    %c0_67 = arith.constant 0 : index
    %331 = vector.load %arg7[%c0_66, %c0_67] : memref<32x128xf32, #tpu.memory_space<vmem>>, vector<32x128xf32>
    %cst_68 = arith.constant dense<0.000000e+00> : vector<8x128xf32>
    %332 = tpu.matmul %330, %331, %cst_68 {dimension_numbers = #tpu.dot_dimension_numbers<[1], [0], [0], [1], [0, 0, 1, 1], [], []>} : vector<8x32xf32>, vector<32x128xf32>, vector<8x128xf32> -> vector<8x128xf32>
    %c0_69 = arith.constant 0 : index
    %c0_70 = arith.constant 0 : index
    %333 = vector.load %arg8[%c0_69, %c0_70] : memref<1x128xf32, #tpu.memory_space<vmem>>, vector<1x128xf32>
    %334 = vector.broadcast %333 : vector<1x128xf32> to vector<8x128xf32>
    %335 = arith.addf %332, %334 : vector<8x128xf32>
    %c0_71 = arith.constant 0 : index
    %c0_72 = arith.constant 0 : index
    %336 = vector.load %arg9[%c0_71, %c0_72] : memref<8x128xf32, #tpu.memory_space<vmem>>, vector<8x128xf32>
    tpu.vector_store %arg9[%c0_71, %c0_72], %335 {strides = array<i32>} : memref<8x128xf32, #tpu.memory_space<vmem>>, vector<8x128xf32>,
    return
  }
}

</mosaic_0001>

<bundles_post_ra>
// kernel: tpu_custom_call.1
= control target key start
LH: loop header
LB: loop body
LE: loop exit
PB: predicated region body
PF: predicated region fallthrough
CT: control target
= control target key end

     0   :  { %14 = vsyncpa [#allocation5], 0  ;;  %s3271_s0 = inlined_call_operand.hbm [shape: f32[8,8], index: 0, kind: input, shape index: {}]   ;;  %s3272_s1 = inlined_call_operand.hbm [shape: f32[8,128], index: 1, kind: input, shape index: {}]   ;;  %s3273_s2 = inlined_call_operand.hbm [shape: f32[32,128], index: 2, kind: input, shape index: {}]   ;;  %s3274_s3 = inlined_call_operand.vmem [shape: f32[1,128], index: 3, kind: input, shape index: {}]   ;;  %s3275_s4 = inlined_call_operand.hbm [shape: f32[32,128], index: 4, kind: input, shape index: {}]   ;;  %s3276_s5 = inlined_call_operand.hbm [shape: f32[32,128], index: 5, kind: input, shape index: {}]   ;;  %s3277_s6 = inlined_call_operand.vmem [shape: f32[1,128], index: 6, kind: input, shape index: {}]   ;;  %s3278_s7 = inlined_call_operand.hbm [shape: f32[32,128], index: 7, kind: input, shape index: {}]   ;;  %s3279_s8 = inlined_call_operand.vmem [shape: f32[1,128], index: 8, kind: input, shape index: {}]   ;;  %s3280_s9 = inlined_call_operand.hbm [shape: f32[8,128], index: 9, kind: output, shape index: {}]  }
   0x1   :  { %15 = vsyncpa [#allocation8], 0 }
   0x2   :  { %16 = vsyncpa [#allocation11], 0 }
   0x3   :  { %17 = vsyncpa [#allocation14], 0 }
   0x4   :  { %18 = vsyncpa [#allocation6], 0  ;;  %s2861_s30 = smov [#allocation7]   ;;  %s2697_s13 = scalar_lea.hbm %s3272_s1, 128 }
   0x5   :  { %s35_s10 = sshll.u32 %s2861_s30, 4  ;;  %p2698_p0 = scmp.ne.s32.totalorder %s3272_s1, %s2697_s13  ;;  %s36_s10 = int_to_ptr.vmem [resolvable:$true] %s35_s10 }
   0x6   :  { %p2701_p1 = scmp.lt.u32.totalorder %s2697_s13, %s3272_s1 }
   0x8   :  { %p2703_p2 = pnand %p2701_p1, %p2698_p0 }
   0xa   :  { %2706 = shalt.err (!%p2703_p2)
}
   0xb   :  { %s2707_s18 = scalar_lea.vmem %s36_s10, 128  ;;  %p2712_p4 = scmp.lt.s32.totalorder %s36_s10, %s36_s10 }
   0xc   :  { %p2708_p3 = scmp.ne.s32.totalorder %s36_s10, %s2707_s18  ;;  %p2713_p5 = scmp.lt.s32.totalorder %s2707_s18, %s2707_s18 }
   0xe   :  { %p2714_p6 = por %p2713_p5, %p2712_p4 }
  0x10   :  { %p2715_p7 = pnand %p2714_p6, %p2708_p3 }
  0x12   :  { %2718 = shalt.err (!%p2715_p7)
}
  0x13   :  { %38 = dma.hbm_to_vmem [thread:$0]  %s3272_s1, 128, %s36_s10, [#allocation8]  }
  0x14   :  { %s2862_s21 = smov [#allocation10]   ;;  %s2863_s23 = smov [#allocation4]  }
  0x15   :  { %s58_s22 = sshll.u32 %s2862_s21, 4  ;;  %s25_s24 = sshll.u32 %s2863_s23, 4  ;;  %s59_s22 = int_to_ptr.vmem [resolvable:$true] %s58_s22  ;;  %s26_s24 = int_to_ptr.vmem [resolvable:$true] %s25_s24 }
  0x16   :  { %s2719_s27 = scalar_lea.hbm %s3275_s4, 512 }
  0x17   :  { %p2720_p8 = scmp.ne.s32.totalorder %s3275_s4, %s2719_s27  ;;  %p2723_p9 = scmp.lt.u32.totalorder %s2719_s27, %s3275_s4 }
  0x19   :  { %p2725_p10 = pnand %p2723_p9, %p2720_p8 }
  0x1b   :  { %2728 = shalt.err (!%p2725_p10)
}
  0x1c   :  { %s2729_s1 = scalar_lea.vmem %s59_s22, 512  ;;  %p2734_p12 = scmp.lt.s32.totalorder %s59_s22, %s59_s22 }
  0x1d   :  { %p2730_p11 = scmp.ne.s32.totalorder %s59_s22, %s2729_s1  ;;  %p2735_p13 = scmp.lt.s32.totalorder %s2729_s1, %s2729_s1 }
  0x1f   :  { %p2736_p0 = por %p2735_p13, %p2734_p12 }
  0x21   :  { %p2737_p1 = pnand %p2736_p0, %p2730_p11 }
  0x23   :  { %2740 = shalt.err (!%p2737_p1)
}
  0x24   :  { %s2864_s10 = smov 128   ;;  %s2865_s12 = smov 8  }
  0x25   :  { %64 = dma.hbm_to_vmem [thread:$0]  %s3275_s4, 512, %s59_s22, [#allocation11], %s2864_s10, %s2864_s10, %s2865_s12  }
  0x26   :  { %s2741_s17 = scalar_lea.hbm %s3271_s0, 128 }
  0x27   :  { %p2742_p2 = scmp.ne.s32.totalorder %s3271_s0, %s2741_s17  ;;  %p2745_p3 = scmp.lt.u32.totalorder %s2741_s17, %s3271_s0 }
  0x29   :  { %p2747_p4 = pnand %p2745_p3, %p2742_p2 }
  0x2b   :  { %2750 = shalt.err (!%p2747_p4)
}
  0x2c   :  { %s2751_s23 = scalar_lea.vmem %s26_s24, 128  ;;  %p2756_p6 = scmp.lt.s32.totalorder %s26_s24, %s26_s24 }
  0x2d   :  { %p2752_p5 = scmp.ne.s32.totalorder %s26_s24, %s2751_s23  ;;  %p2757_p7 = scmp.lt.s32.totalorder %s2751_s23, %s2751_s23 }
  0x2f   :  { %p2758_p8 = por %p2757_p7, %p2756_p6 }
  0x31   :  { %p2759_p9 = pnand %p2758_p8, %p2752_p5 }
  0x33   :  { %2762 = shalt.err (!%p2759_p9)
}
  0x34   :  { %28 = dma.hbm_to_vmem [thread:$0]  %s3271_s0, 128, %s26_s24, [#allocation5]  }
  0x35   :  { %s2866_s25 = smov [#allocation9]   ;;  %s2867_s27 = smov [#allocation12]  }
  0x36   :  { %s44_s26 = sshll.u32 %s2866_s25, 4  ;;  %s70_s28 = sshll.u32 %s2867_s27, 4  ;;  %s45_s26 = int_to_ptr.vmem [resolvable:$true] %s44_s26  ;;  %s71_s28 = int_to_ptr.vmem [resolvable:$true] %s70_s28 }
  0x37   :  { %s2763_s11 = scalar_lea.hbm %s3273_s2, 512 }
  0x38   :  { %p2764_p10 = scmp.ne.s32.totalorder %s3273_s2, %s2763_s11  ;;  %p2767_p11 = scmp.lt.u32.totalorder %s2763_s11, %s3273_s2 }
  0x3a   :  { %p2769_p12 = pnand %p2767_p11, %p2764_p10 }
  0x3c   :  { %2772 = shalt.err (!%p2769_p12)
}
  0x3d   :  { %s2773_s0 = scalar_lea.vmem %s45_s26, 512  ;;  %p2778_p0 = scmp.lt.s32.totalorder %s45_s26, %s45_s26 }
  0x3e   :  { %p2774_p13 = scmp.ne.s32.totalorder %s45_s26, %s2773_s0  ;;  %p2779_p1 = scmp.lt.s32.totalorder %s2773_s0, %s2773_s0 }
  0x40   :  { %p2780_p2 = por %p2779_p1, %p2778_p0 }
  0x42   :  { %p2781_p3 = pnand %p2780_p2, %p2774_p13 }
  0x44   :  { %2784 = shalt.err (!%p2781_p3)
}
  0x45   :  { %50 = dma.hbm_to_vmem [thread:$0]  %s3273_s2, 512, %s45_s26, [#allocation8], %s2864_s10, %s2864_s10, %s2865_s12  }
  0x46   :  { %s2785_s19 = scalar_lea.hbm %s3276_s5, 512 }
  0x47   :  { %p2786_p4 = scmp.ne.s32.totalorder %s3276_s5, %s2785_s19  ;;  %p2789_p5 = scmp.lt.u32.totalorder %s2785_s19, %s3276_s5 }
  0x49   :  { %p2791_p6 = pnand %p2789_p5, %p2786_p4 }
  0x4b   :  { %2794 = shalt.err (!%p2791_p6)
}
  0x4c   :  { %s2795_s22 = scalar_lea.vmem %s71_s28, 512  ;;  %p2800_p8 = scmp.lt.s32.totalorder %s71_s28, %s71_s28 }
  0x4d   :  { %p2796_p7 = scmp.ne.s32.totalorder %s71_s28, %s2795_s22  ;;  %p2801_p9 = scmp.lt.s32.totalorder %s2795_s22, %s2795_s22 }
  0x4f   :  { %p2802_p10 = por %p2801_p9, %p2800_p8 }
  0x51   :  { %p2803_p11 = pnand %p2802_p10, %p2796_p7 }
  0x53   :  { %2806 = shalt.err (!%p2803_p11)
}
  0x54   :  { %76 = dma.hbm_to_vmem [thread:$0]  %s3276_s5, 512, %s71_s28, [#allocation11], %s2864_s10, %s2864_s10, %s2865_s12  }
  0x55   :  { %s2868_s26 = smov [#allocation13]   ;;  %s2807_s11 = scalar_lea.hbm %s3278_s7, 512 }
  0x56   :  { %s84_s27 = sshll.u32 %s2868_s26, 4  ;;  %p2808_p12 = scmp.ne.s32.totalorder %s3278_s7, %s2807_s11  ;;  %s85_s27 = int_to_ptr.vmem [resolvable:$true] %s84_s27 }
  0x57   :  { %p2811_p13 = scmp.lt.u32.totalorder %s2807_s11, %s3278_s7 }
  0x59   :  { %p2813_p0 = pnand %p2811_p13, %p2808_p12 }
  0x5b   :  { %2816 = shalt.err (!%p2813_p0)
}
  0x5c   :  { %s2817_s0 = scalar_lea.vmem %s85_s27, 512  ;;  %p2822_p2 = scmp.lt.s32.totalorder %s85_s27, %s85_s27 }
  0x5d   :  { %p2818_p1 = scmp.ne.s32.totalorder %s85_s27, %s2817_s0  ;;  %p2823_p3 = scmp.lt.s32.totalorder %s2817_s0, %s2817_s0 }
  0x5f   :  { %p2824_p4 = por %p2823_p3, %p2822_p2 }
  0x61   :  { %p2825_p5 = pnand %p2824_p4, %p2818_p1 }
  0x63   :  { %2828 = shalt.err (!%p2825_p5)
}
  0x64   :  { %90 = dma.hbm_to_vmem [thread:$0]  %s3278_s7, 512, %s85_s27, [#allocation14], %s2864_s10, %s2864_s10, %s2865_s12  }
  0x65   :  { %2851 = dma.done.wait [#allocation5], 128  }
  0x66   :  { %2852 = vsyncadd [#allocation5], 4294967168 }
  0x67   :  { %2853 = dma.done.wait [#allocation8], 640  }
  0x68   :  { %2854 = vsyncadd [#allocation8], 4294966656 }
  0x69   :  { %2855 = dma.done.wait [#allocation11], 1024  }
  0x6a   :  { %2856 = vsyncadd [#allocation11], 4294966272 }
  0x6b   :  { %2857 = dma.done.wait [#allocation14], 512  }
  0x6c   :  { %2858 = vsyncadd [#allocation14], 4294966784  ;;  %v2869_v0 = vmov 0.0|0.0   ;;  %v2870_v1 = vmov 0.0   ;;  %vm2871_vm0 = vmmov 0   ;;  %vm120_vm1 = vcmask 64512  }
  0x6d   :  { %2447 = vmatprep.subr.bf16.mxu1 %v2869_v0  ;;  %2244 = vmatprep.subr.mxu0 %v2870_v1  ;;  %v195_v2 = vld [vmem:[#allocation9] sm:$0xff]  ;;  %v196_v3 = vld [vmem:[#allocation9 + $0x8] sm:$0xff]  ;;  %v112_v4 = vld [vmem:[#allocation7] sm:$0xff]  ;;  %s2872_s12 = smov 32   ;;  %vm200_vm2 = vcmask 261120   ;;  %vm1047_vm3 = vcmask 1040384  }
  0x6e   :  { %2246 = vmatprep.mubr.msk.f32.mxu0 %vm2871_vm0, %v2870_v1  ;;  %2257 = vmatprep.mubr.msk.f32.mxu1 %vm2871_vm0, %v2870_v1  ;;  %v3015_v5 = vpack.c.bf16 %v196_v3, %v195_v2  ;;  %v111_v6 = vld [vmem:[#allocation4] sm:$0xff]  ;;  %v198_v8 = vld [vmem:[#allocation9 + $0x18] sm:$0xff]  ;;  %v2116_v12 = vld [vmem:[%s3274_s3] ss:$0 sm:$0xff]  ;;  %s2873_s3 = smov 64   ;;  %vm1049_vm4 = vcmask 1041408  }
  0x6f   :  { %2245 = vmatpush3.msra.mxu0 %v112_v4  ;;  %v197_v7 = vld [vmem:[#allocation9 + $0x10] sm:$0xff]  ;;  %vm1051_vm5 = vcmask 1042432   ;;  %vm1053_vm6 = vcmask 1043456   ;;  %vm1055_vm7 = vcmask 1044480   ;;  %vm1057_vm8 = vcmask 1045504   ;;  %s2874_s18 = smov [#allocation15]  }
  0x70   :  { %2247 = vmatmul.mubr.msk.f32.vlgmr.msra.gmra.mrb[0].mxu0 %vm120_vm1, %v111_v6  ;;  %2453 = vmatprep.subr.bf16.mxu0 %v2869_v0  ;;  %v3019_v9 = vpack.c.bf16 %v198_v8, %v197_v7  ;;  %vm1059_vm9 = vcmask 1046528   ;;  %s2104_s19 = sshll.u32 %s2874_s18, 4  ;;  %s2105_s19 = int_to_ptr.vmem [resolvable:$true] %s2104_s19 }
  0x71   :  { %2449 = vmatpush3.bf16.msra.mxu1 %v3015_v5  ;;  %2455 = vmatpush3.bf16.msra.mxu0 %v3015_v5  ;;  %s2829_s20 = scalar_lea.vmem %s2105_s19, 128  ;;  %p2834_p7 = scmp.lt.s32.totalorder %s2105_s19, %s2105_s19 }
  0x72   :  { %2450 = vmatprep.subr.bf16.mxu1 %v2869_v0  ;;  %2456 = vmatprep.subr.bf16.mxu0 %v2869_v0  ;;  %p2830_p6 = scmp.ne.s32.totalorder %s2105_s19, %s2829_s20  ;;  %p2835_p8 = scmp.lt.s32.totalorder %s2829_s20, %s2829_s20 }
  0x73   :  { %2268 = vmatprep.mubr.msk.f32.mxu0 %vm2871_vm0, %v2870_v1 }
  0x74   :  { %p2836_p9 = por %p2835_p8, %p2834_p7 }
  0x75   :  { %2452 = vmatpush3.bf16.msra.mxu1 %v3019_v9  ;;  %2458 = vmatpush3.bf16.msra.mxu0 %v3019_v9 }
  0x76   :  { %2459 = vmatprep.subr.bf16.mxu1 %v2869_v0  ;;  %2465 = vmatprep.subr.bf16.mxu0 %v2869_v0  ;;  %p2837_p10 = pnand %p2836_p9, %p2830_p6 }
  0x78   :  { %2258 = vmatmul.mubr.f32.vlgmr.msra.gmra.mrb[0].mxu1 %v2870_v1 }
  0x79   :  { %2461 = vmatpush3.bf16.msra.mxu1 %v3015_v5  ;;  %2279 = vmatprep.mubr.msk.f32.mxu1 %vm2871_vm0, %v2870_v1 }
  0x7a   :  { %2462 = vmatprep.subr.bf16.mxu1 %v2869_v0 }
  0x7d   :  { %2464 = vmatpush3.bf16.msra.mxu1 %v3019_v9 }
  0x7e   :  { %2471 = vmatprep.subr.bf16.mxu1 %v2869_v0 }
 0x143   :  { %v190_v10 = vpop.f32.mrb[0].mxu0 }
 0x144   :  { %v2248_v11 = vpop.f32.mrb[1].mxu0  ;;  %v3040_v13 = vadd.f32 %v2116_v12, %v190_v10 }
 0x14b   :  { %v270_v14 = vpop.f32.mrb[0].mxu1 }
 0x14c   :  { %v274_v15 = vadd.f32 %v270_v14, %v3040_v13  ;;  %v2259_v16 = vpop.f32.mrb[1].mxu1 }
 0x14e   :  { %2569 = vtanh.f32 %v274_v15  ;;  %v2118_v18 = vmul.f32 -1.442695, %v274_v15 }
 0x150   :  { %2571 = vpow2.f32 %v2118_v18 }
 0x158   :  { %v2570_v17 = vpop.eup %2569 }
 0x159   :  { %284 = vrot.lane.b32.xlu0 %v2570_v17, %s2872_s12 }
 0x15a   :  { %v2572_v19 = vpop.eup %2571 }
 0x15b   :  { %v278_v20 = vadd.f32 1.0, %v2572_v19 }
 0x15d   :  { %2573 = vrcp.f32 %v278_v20 }
 0x167   :  { %v2574_v21 = vpop.eup %2573 }
 0x168   :  { %v282_v24 = vmul.f32 0.0, %v2574_v21 }
 0x1cb   :  { %v285_v22 = vpop.permute.xlu0 %284 }
 0x1cc   :  { %v287_v23 = vmul.f32 %v2574_v21, %v285_v22 }
 0x1ce   :  { %289 = vrot.lane.b32.xlu0 %v287_v23, %s2872_s12 }
 0x240   :  { %v290_v25 = vpop.permute.xlu0 %289 }
 0x241   :  { %v292_v26 = vadd.f32 %v290_v25, %v282_v24 }
 0x243   :  { %2575 = vtanh.f32 %v292_v26  ;;  %v386_v42 = vrot.slane %v292_v26, 7 }
 0x24d   :  { %v2576_v27 = vpop.eup %2575 }
 0x24e   :  { %295 = vrot.lane.b32.xlu1 %v2576_v27, %s2872_s12 }
 0x2c0   :  { %v296_v28 = vpop.permute.xlu1 %295 }
 0x2c1   :  { %v3046_v29 = vmul.f32 %v2574_v21, %v296_v28 }
 0x2c3   :  { %300 = vrot.lane.b32.xlu1 %v3046_v29, %s2873_s3 }
 0x335   :  { %v301_v30 = vpop.permute.xlu1 %300 }
 0x336   :  { %2269 = vmatmul.mubr.msk.f32.vlgmr.msra.gmra.mrb[2].mxu0 %vm200_vm2, %v301_v30 }
 0x337   :  { %2467 = vmatpush3.bf16.msra.mxu0 %v3015_v5  ;;  %2290 = vmatprep.mubr.msk.f32.mxu0 %vm2871_vm0, %v2870_v1 }
 0x338   :  { %2468 = vmatprep.subr.bf16.mxu0 %v2869_v0 }
 0x33b   :  { %2470 = vmatpush3.bf16.msra.mxu0 %v3019_v9 }
 0x33c   :  { %2477 = vmatprep.subr.bf16.mxu0 %v2869_v0 }
 0x409   :  { %v370_v31 = vpop.f32.mrb[2].mxu0 }
 0x40a   :  { %v375_v32 = vrot.slane %v370_v31, 7  ;;  %v2270_v33 = vpop.f32.mrb[3].mxu0 }
 0x40c   :  { %v377_v34 = vadd.f32 %v375_v32, %v3040_v13 }
 0x40e   :  { %2577 = vtanh.f32 %v377_v34  ;;  %v2120_v36 = vmul.f32 -1.442695, %v377_v34 }
 0x410   :  { %2579 = vpow2.f32 %v2120_v36 }
 0x418   :  { %v2578_v35 = vpop.eup %2577 }
 0x419   :  { %390 = vrot.lane.b32.xlu0 %v2578_v35, %s2872_s12 }
 0x41a   :  { %v2580_v37 = vpop.eup %2579 }
 0x41b   :  { %v381_v38 = vadd.f32 1.0, %v2580_v37 }
 0x41d   :  { %2581 = vrcp.f32 %v381_v38 }
 0x427   :  { %v2582_v39 = vpop.eup %2581 }
 0x428   :  { %v388_v43 = vmul.f32 %v2582_v39, %v386_v42 }
 0x48b   :  { %v391_v40 = vpop.permute.xlu0 %390 }
 0x48c   :  { %v393_v41 = vmul.f32 %v2582_v39, %v391_v40 }
 0x48e   :  { %395 = vrot.lane.b32.xlu1 %v393_v41, %s2872_s12 }
 0x500   :  { %v396_v44 = vpop.permute.xlu1 %395 }
 0x501   :  { %v398_v45 = vadd.f32 %v396_v44, %v388_v43 }
 0x503   :  { %2583 = vtanh.f32 %v398_v45  ;;  %v493_v62 = vrot.slane %v398_v45, 7 }
 0x50d   :  { %v2584_v46 = vpop.eup %2583 }
 0x50e   :  { %401 = vrot.lane.b32.xlu0 %v2584_v46, %s2872_s12 }
 0x580   :  { %v402_v47 = vpop.permute.xlu0 %401 }
 0x581   :  { %v404_v48 = vmul.f32 %v2582_v39, %v402_v47 }
 0x583   :  { %v406_v49 = vrot.slane %v404_v48, 1  ;;  %v1048_v8 = vsel %vm1047_vm3, %v3046_v29, %v404_v48 }
 0x585   :  { %407 = vrot.lane.b32.xlu1 %v406_v49, %s2873_s3 }
 0x5f7   :  { %v408_v50 = vpop.permute.xlu1 %407 }
 0x5f8   :  { %2280 = vmatmul.mubr.msk.f32.vlgmr.msra.gmra.mrb[2].mxu1 %vm200_vm2, %v408_v50 }
 0x5f9   :  { %2473 = vmatpush3.bf16.msra.mxu1 %v3015_v5  ;;  %2301 = vmatprep.mubr.msk.f32.mxu1 %vm2871_vm0, %v2870_v1 }
 0x5fa   :  { %2474 = vmatprep.subr.bf16.mxu1 %v2869_v0 }
 0x5fd   :  { %2476 = vmatpush3.bf16.msra.mxu1 %v3019_v9 }
 0x5fe   :  { %2483 = vmatprep.subr.bf16.mxu1 %v2869_v0 }
 0x6cb   :  { %v477_v51 = vpop.f32.mrb[2].mxu1 }
 0x6cc   :  { %v482_v52 = vrot.slane %v477_v51, 6  ;;  %v2281_v53 = vpop.f32.mrb[3].mxu1 }
 0x6ce   :  { %v484_v54 = vadd.f32 %v482_v52, %v3040_v13 }
 0x6d0   :  { %2585 = vtanh.f32 %v484_v54  ;;  %v2122_v56 = vmul.f32 -1.442695, %v484_v54 }
 0x6d2   :  { %2587 = vpow2.f32 %v2122_v56 }
 0x6da   :  { %v2586_v55 = vpop.eup %2585 }
 0x6db   :  { %497 = vrot.lane.b32.xlu0 %v2586_v55, %s2872_s12 }
 0x6dc   :  { %v2588_v57 = vpop.eup %2587 }
 0x6dd   :  { %v488_v58 = vadd.f32 1.0, %v2588_v57 }
 0x6df   :  { %2589 = vrcp.f32 %v488_v58 }
 0x6e9   :  { %v2590_v59 = vpop.eup %2589 }
 0x6ea   :  { %v495_v63 = vmul.f32 %v2590_v59, %v493_v62 }
 0x74d   :  { %v498_v60 = vpop.permute.xlu0 %497 }
 0x74e   :  { %v500_v61 = vmul.f32 %v2590_v59, %v498_v60 }
 0x750   :  { %502 = vrot.lane.b32.xlu1 %v500_v61, %s2872_s12 }
 0x7c2   :  { %v503_v2 = vpop.permute.xlu1 %502 }
 0x7c3   :  { %v505_v3 = vadd.f32 %v503_v2, %v495_v63 }
 0x7c5   :  { %2591 = vtanh.f32 %v505_v3  ;;  %v600_v25 = vrot.slane %v505_v3, 7 }
 0x7cf   :  { %v2592_v4 = vpop.eup %2591 }
 0x7d0   :  { %508 = vrot.lane.b32.xlu0 %v2592_v4, %s2872_s12 }
 0x842   :  { %v509_v6 = vpop.permute.xlu0 %508 }
 0x843   :  { %v511_v7 = vmul.f32 %v2590_v59, %v509_v6 }
 0x845   :  { %v513_v10 = vrot.slane %v511_v7, 2  ;;  %v1050_v11 = vsel %vm1049_vm4, %v1048_v8, %v511_v7 }
 0x847   :  { %514 = vrot.lane.b32.xlu1 %v513_v10, %s2873_s3 }
 0x8b9   :  { %v515_v12 = vpop.permute.xlu1 %514 }
 0x8ba   :  { %2291 = vmatmul.mubr.msk.f32.vlgmr.msra.gmra.mrb[4].mxu0 %vm200_vm2, %v515_v12 }
 0x8bb   :  { %2479 = vmatpush3.bf16.msra.mxu0 %v3015_v5  ;;  %2312 = vmatprep.mubr.msk.f32.mxu0 %vm2871_vm0, %v2870_v1 }
 0x8bc   :  { %2480 = vmatprep.subr.bf16.mxu0 %v2869_v0 }
 0x8bf   :  { %2482 = vmatpush3.bf16.msra.mxu0 %v3019_v9 }
 0x8c0   :  { %2489 = vmatprep.subr.bf16.mxu0 %v2869_v0 }
 0x98d   :  { %v584_v14 = vpop.f32.mrb[4].mxu0 }
 0x98e   :  { %v589_v15 = vrot.slane %v584_v14, 5  ;;  %v2292_v16 = vpop.f32.mrb[5].mxu0 }
 0x990   :  { %v591_v17 = vadd.f32 %v589_v15, %v3040_v13 }
 0x992   :  { %2593 = vtanh.f32 %v591_v17  ;;  %v2124_v19 = vmul.f32 -1.442695, %v591_v17 }
 0x994   :  { %2595 = vpow2.f32 %v2124_v19 }
 0x99c   :  { %v2594_v18 = vpop.eup %2593 }
 0x99d   :  { %604 = vrot.lane.b32.xlu0 %v2594_v18, %s2872_s12 }
 0x99e   :  { %v2596_v20 = vpop.eup %2595 }
 0x99f   :  { %v595_v21 = vadd.f32 1.0, %v2596_v20 }
 0x9a1   :  { %2597 = vrcp.f32 %v595_v21 }
 0x9ab   :  { %v2598_v22 = vpop.eup %2597 }
 0x9ac   :  { %v602_v26 = vmul.f32 %v2598_v22, %v600_v25 }
 0xa0f   :  { %v605_v23 = vpop.permute.xlu0 %604 }
 0xa10   :  { %v607_v24 = vmul.f32 %v2598_v22, %v605_v23 }
 0xa12   :  { %609 = vrot.lane.b32.xlu1 %v607_v24, %s2872_s12 }
 0xa84   :  { %v610_v27 = vpop.permute.xlu1 %609 }
 0xa85   :  { %v612_v28 = vadd.f32 %v610_v27, %v602_v26 }
 0xa87   :  { %2599 = vtanh.f32 %v612_v28  ;;  %v707_v46 = vrot.slane %v612_v28, 7 }
 0xa91   :  { %v2600_v29 = vpop.eup %2599 }
 0xa92   :  { %615 = vrot.lane.b32.xlu0 %v2600_v29, %s2872_s12 }
 0xb04   :  { %v616_v30 = vpop.permute.xlu0 %615 }
 0xb05   :  { %v618_v31 = vmul.f32 %v2598_v22, %v616_v30 }
 0xb07   :  { %v620_v32 = vrot.slane %v618_v31, 3  ;;  %v1052_v33 = vsel %vm1051_vm5, %v1050_v11, %v618_v31 }
 0xb09   :  { %621 = vrot.lane.b32.xlu1 %v620_v32, %s2873_s3 }
 0xb7b   :  { %v622_v34 = vpop.permute.xlu1 %621 }
 0xb7c   :  { %2302 = vmatmul.mubr.msk.f32.vlgmr.msra.gmra.mrb[4].mxu1 %vm200_vm2, %v622_v34 }
 0xb7d   :  { %2485 = vmatpush3.bf16.msra.mxu1 %v3015_v5  ;;  %2323 = vmatprep.mubr.msk.f32.mxu1 %vm2871_vm0, %v2870_v1 }
 0xb7e   :  { %2486 = vmatprep.subr.bf16.mxu1 %v2869_v0 }
 0xb81   :  { %2488 = vmatpush3.bf16.msra.mxu1 %v3019_v9 }
 0xb82   :  { %2495 = vmatprep.subr.bf16.mxu1 %v2869_v0 }
 0xc4f   :  { %v691_v35 = vpop.f32.mrb[4].mxu1 }
 0xc50   :  { %v696_v36 = vrot.slane %v691_v35, 4  ;;  %v2303_v37 = vpop.f32.mrb[5].mxu1 }
 0xc52   :  { %v698_v38 = vadd.f32 %v696_v36, %v3040_v13 }
 0xc54   :  { %2601 = vtanh.f32 %v698_v38  ;;  %v2126_v40 = vmul.f32 -1.442695, %v698_v38 }
 0xc56   :  { %2603 = vpow2.f32 %v2126_v40 }
 0xc5e   :  { %v2602_v39 = vpop.eup %2601 }
 0xc5f   :  { %711 = vrot.lane.b32.xlu0 %v2602_v39, %s2872_s12 }
 0xc60   :  { %v2604_v41 = vpop.eup %2603 }
 0xc61   :  { %v702_v42 = vadd.f32 1.0, %v2604_v41 }
 0xc63   :  { %2605 = vrcp.f32 %v702_v42 }
 0xc6d   :  { %v2606_v43 = vpop.eup %2605 }
 0xc6e   :  { %v709_v47 = vmul.f32 %v2606_v43, %v707_v46 }
 0xcd1   :  { %v712_v44 = vpop.permute.xlu0 %711 }
 0xcd2   :  { %v714_v45 = vmul.f32 %v2606_v43, %v712_v44 }
 0xcd4   :  { %716 = vrot.lane.b32.xlu1 %v714_v45, %s2872_s12 }
 0xd46   :  { %v717_v48 = vpop.permute.xlu1 %716 }
 0xd47   :  { %v719_v49 = vadd.f32 %v717_v48, %v709_v47 }
 0xd49   :  { %2607 = vtanh.f32 %v719_v49 }
 0xd53   :  { %v2608_v50 = vpop.eup %2607 }
 0xd54   :  { %722 = vrot.lane.b32.xlu0 %v2608_v50, %s2872_s12 }
 0xdc6   :  { %v723_v51 = vpop.permute.xlu0 %722 }
 0xdc7   :  { %v725_v52 = vmul.f32 %v2606_v43, %v723_v51 }
 0xdc9   :  { %v727_v53 = vrot.slane %v725_v52, 4  ;;  %v1054_v54 = vsel %vm1053_vm6, %v1052_v33, %v725_v52  ;;  %v1067_v52 = vld [vmem:[#allocation10] sm:$0xff] }
 0xdcb   :  { %728 = vrot.lane.b32.xlu1 %v727_v53, %s2873_s3  ;;  %v1068_v53 = vld [vmem:[#allocation10 + $0x8] sm:$0xff] }
 0xe3d   :  { %v729_v55 = vpop.permute.xlu1 %728 }
 0xe3e   :  { %2313 = vmatmul.mubr.msk.f32.vlgmr.msra.gmra.mrb[6].mxu0 %vm200_vm2, %v729_v55  ;;  %v1152_v55 = vld [vmem:[#allocation12] sm:$0xff] }
 0xe3f   :  { %2491 = vmatpush3.bf16.msra.mxu0 %v3015_v5  ;;  %2334 = vmatprep.mubr.msk.f32.mxu0 %vm2871_vm0, %v2870_v1 }
 0xe40   :  { %2492 = vmatprep.subr.bf16.mxu0 %v2869_v0 }
 0xe43   :  { %2494 = vmatpush3.bf16.msra.mxu0 %v3019_v9  ;;  %v814_v9 = vrot.slane %v719_v49, 7 }
 0xe44   :  { %2501 = vmatprep.subr.bf16.mxu0 %v2869_v0 }
 0xf11   :  { %v798_v56 = vpop.f32.mrb[6].mxu0 }
 0xf12   :  { %v803_v57 = vrot.slane %v798_v56, 3  ;;  %v2314_v58 = vpop.f32.mrb[7].mxu0  ;;  %v1153_v56 = vld [vmem:[#allocation12 + $0x8] sm:$0xff] }
 0xf13   :  { %v1069_v58 = vld [vmem:[#allocation10 + $0x10] sm:$0xff] }
 0xf14   :  { %v805_v59 = vadd.f32 %v803_v57, %v3040_v13  ;;  %v3132_v57 = vpack.c.bf16 %v1153_v56, %v1152_v55 }
 0xf16   :  { %2609 = vtanh.f32 %v805_v59  ;;  %v2128_v61 = vmul.f32 -1.442695, %v805_v59  ;;  %v1070_v59 = vld [vmem:[#allocation10 + $0x18] sm:$0xff] }
 0xf18   :  { %2611 = vpow2.f32 %v2128_v61  ;;  %v2499_v61 = vpack.c.bf16 %v1070_v59, %v1069_v58 }
 0xf20   :  { %v2610_v60 = vpop.eup %2609 }
 0xf21   :  { %818 = vrot.lane.b32.xlu0 %v2610_v60, %s2872_s12  ;;  %v1154_v60 = vld [vmem:[#allocation12 + $0x10] sm:$0xff] }
 0xf22   :  { %v2612_v5 = vpop.eup %2611 }
 0xf23   :  { %v809_v62 = vadd.f32 1.0, %v2612_v5  ;;  %v1155_v5 = vld [vmem:[#allocation12 + $0x18] sm:$0xff] }
 0xf25   :  { %2613 = vrcp.f32 %v809_v62  ;;  %v3136_v62 = vpack.c.bf16 %v1155_v5, %v1154_v60 }
 0xf2f   :  { %v2614_v63 = vpop.eup %2613 }
 0xf30   :  { %v816_v4 = vmul.f32 %v2614_v63, %v814_v9 }
 0xf93   :  { %v819_v2 = vpop.permute.xlu0 %818 }
 0xf94   :  { %v821_v3 = vmul.f32 %v2614_v63, %v819_v2 }
 0xf96   :  { %823 = vrot.lane.b32.xlu1 %v821_v3, %s2872_s12 }
0x1008   :  { %v824_v6 = vpop.permute.xlu1 %823 }
0x1009   :  { %v826_v7 = vadd.f32 %v824_v6, %v816_v4 }
0x100b   :  { %2615 = vtanh.f32 %v826_v7  ;;  %v921_v27 = vrot.slane %v826_v7, 7 }
0x1015   :  { %v2616_v8 = vpop.eup %2615 }
0x1016   :  { %829 = vrot.lane.b32.xlu0 %v2616_v8, %s2872_s12  ;;  %v2133_v8 = vld [vmem:[%s3277_s6] ss:$0 sm:$0xff] }
0x1088   :  { %v830_v10 = vpop.permute.xlu0 %829 }
0x1089   :  { %v832_v11 = vmul.f32 %v2614_v63, %v830_v10 }
0x108b   :  { %v834_v12 = vrot.slane %v832_v11, 5  ;;  %v1056_v14 = vsel %vm1055_vm7, %v1054_v54, %v832_v11  ;;  %v2496_v54 = vpack.c.bf16 %v1068_v53, %v1067_v52 }
0x108d   :  { %835 = vrot.lane.b32.xlu1 %v834_v12, %s2873_s3 }
0x10ff   :  { %v836_v15 = vpop.permute.xlu1 %835 }
0x1100   :  { %2324 = vmatmul.mubr.msk.f32.vlgmr.msra.gmra.mrb[6].mxu1 %vm200_vm2, %v836_v15 }
0x1101   :  { %2345 = vmatprep.mubr.msk.f32.mxu1 %vm2871_vm0, %v2870_v1  ;;  %2497 = vmatpush3.bf16.msra.mxu1 %v2496_v54 }
0x1102   :  { %2498 = vmatprep.subr.bf16.mxu1 %v2869_v0 }
0x1105   :  { %2500 = vmatpush3.bf16.msra.mxu1 %v2499_v61 }
0x1106   :  { %2507 = vmatprep.subr.bf16.mxu1 %v2869_v0 }
0x11d3   :  { %v905_v16 = vpop.f32.mrb[6].mxu1 }
0x11d4   :  { %v910_v17 = vrot.slane %v905_v16, 2  ;;  %v2325_v18 = vpop.f32.mrb[7].mxu1 }
0x11d6   :  { %v912_v19 = vadd.f32 %v910_v17, %v3040_v13 }
0x11d8   :  { %2617 = vtanh.f32 %v912_v19  ;;  %v2130_v21 = vmul.f32 -1.442695, %v912_v19 }
0x11da   :  { %2619 = vpow2.f32 %v2130_v21 }
0x11e2   :  { %v2618_v20 = vpop.eup %2617 }
0x11e3   :  { %925 = vrot.lane.b32.xlu0 %v2618_v20, %s2872_s12 }
0x11e4   :  { %v2620_v22 = vpop.eup %2619 }
0x11e5   :  { %v916_v23 = vadd.f32 1.0, %v2620_v22 }
0x11e7   :  { %2621 = vrcp.f32 %v916_v23 }
0x11f1   :  { %v2622_v24 = vpop.eup %2621 }
0x11f2   :  { %v923_v28 = vmul.f32 %v2622_v24, %v921_v27 }
0x1255   :  { %v926_v25 = vpop.permute.xlu0 %925 }
0x1256   :  { %v928_v26 = vmul.f32 %v2622_v24, %v926_v25 }
0x1258   :  { %930 = vrot.lane.b32.xlu1 %v928_v26, %s2872_s12 }
0x12ca   :  { %v931_v29 = vpop.permute.xlu1 %930 }
0x12cb   :  { %v933_v30 = vadd.f32 %v931_v29, %v923_v28 }
0x12cd   :  { %2623 = vtanh.f32 %v933_v30  ;;  %v1028_v48 = vrot.slane %v933_v30, 7 }
0x12d7   :  { %v2624_v31 = vpop.eup %2623 }
0x12d8   :  { %936 = vrot.lane.b32.xlu0 %v2624_v31, %s2872_s12 }
0x134a   :  { %v937_v32 = vpop.permute.xlu0 %936 }
0x134b   :  { %v939_v33 = vmul.f32 %v2622_v24, %v937_v32 }
0x134d   :  { %v941_v34 = vrot.slane %v939_v33, 6  ;;  %v1058_v35 = vsel %vm1057_vm8, %v1056_v14, %v939_v33 }
0x134f   :  { %942 = vrot.lane.b32.xlu1 %v941_v34, %s2873_s3 }
0x13c1   :  { %v943_v36 = vpop.permute.xlu1 %942 }
0x13c2   :  { %2335 = vmatmul.mubr.msk.f32.vlgmr.msra.gmra.mrb[8].mxu0 %vm200_vm2, %v943_v36 }
0x13c3   :  { %2356 = vmatprep.mubr.msk.f32.mxu0 %vm2871_vm0, %v2870_v1  ;;  %2503 = vmatpush3.bf16.msra.mxu0 %v3132_v57 }
0x13c4   :  { %2504 = vmatprep.subr.bf16.mxu0 %v2869_v0 }
0x13c7   :  { %2506 = vmatpush3.bf16.msra.mxu0 %v3136_v62 }
0x13c8   :  { %2513 = vmatprep.subr.bf16.mxu0 %v2869_v0 }
0x13ca   :  { %2357 = vmatmul.mubr.f32.vlgmr.msra.gmra.mrb[10].mxu0 %v2870_v1 }
0x13cb   :  { %2515 = vmatpush3.bf16.msra.mxu0 %v3132_v57  ;;  %2378 = vmatprep.mubr.msk.f32.mxu0 %vm2871_vm0, %v2870_v1 }
0x13cc   :  { %2516 = vmatprep.subr.bf16.mxu0 %v2869_v0 }
0x13cf   :  { %2518 = vmatpush3.bf16.msra.mxu0 %v3136_v62 }
0x13d0   :  { %2525 = vmatprep.subr.bf16.mxu0 %v2869_v0 }
0x1495   :  { %v1012_v37 = vpop.f32.mrb[8].mxu0 }
0x1496   :  { %v1017_v38 = vrot.slane %v1012_v37, 1  ;;  %v2336_v39 = vpop.f32.mrb[9].mxu0 }
0x1498   :  { %v1019_v40 = vadd.f32 %v1017_v38, %v3040_v13 }
0x149a   :  { %2625 = vtanh.f32 %v1019_v40  ;;  %v2132_v42 = vmul.f32 -1.442695, %v1019_v40 }
0x149c   :  { %2627 = vpow2.f32 %v2132_v42 }
0x149d   :  { %v1223_v6 = vpop.f32.mrb[10].mxu0 }
0x149e   :  { %v2358_v7 = vpop.f32.mrb[11].mxu0 }
0x14a4   :  { %v2626_v41 = vpop.eup %2625 }
0x14a5   :  { %1032 = vrot.lane.b32.xlu0 %v2626_v41, %s2872_s12 }
0x14a6   :  { %v2628_v43 = vpop.eup %2627 }
0x14a7   :  { %v1023_v44 = vadd.f32 1.0, %v2628_v43 }
0x14a9   :  { %2629 = vrcp.f32 %v1023_v44 }
0x14b3   :  { %v2630_v45 = vpop.eup %2629 }
0x14b4   :  { %v1030_v49 = vmul.f32 %v2630_v45, %v1028_v48 }
0x1517   :  { %v1033_v46 = vpop.permute.xlu0 %1032 }
0x1518   :  { %v1035_v47 = vmul.f32 %v2630_v45, %v1033_v46 }
0x151a   :  { %1037 = vrot.lane.b32.xlu1 %v1035_v47, %s2872_s12 }
0x158c   :  { %v1038_v50 = vpop.permute.xlu1 %1037 }
0x158d   :  { %v1040_v51 = vadd.f32 %v1038_v50, %v1030_v49 }
0x158f   :  { %2631 = vtanh.f32 %v1040_v51 }
0x1599   :  { %v2632_v13 = vpop.eup %2631 }
0x159a   :  { %1043 = vrot.lane.b32.xlu0 %v2632_v13, %s2872_s12 }
0x160c   :  { %v1044_v63 = vpop.permute.xlu0 %1043 }
0x160d   :  { %v1046_v2 = vmul.f32 %v2630_v45, %v1044_v63 }
0x160f   :  { %v1060_v3 = vsel %vm1059_vm9, %v1058_v35, %v1046_v2 }
0x1610   :  { %1062 = vrot.lane.b32.xlu1 %v1060_v3, %s2873_s3 }
0x1682   :  { %v1063_v9 = vpop.permute.xlu1 %1062 }
0x1683   :  { %1065 = vst.msk [vmem:[#allocation3] sm:$0xff] %vm200_vm2, %v1063_v9 }
0x168a   :  { %v1066_v4 = vld [vmem:[#allocation3] sm:$0xff] }
0x168b   :  { %2346 = vmatmul.mubr.msk.f32.vlgmr.msra.gmra.mrb[8].mxu1 %vm200_vm2, %v1066_v4 }
0x168c   :  { %2509 = vmatpush3.bf16.msra.mxu1 %v3132_v57  ;;  %2367 = vmatprep.mubr.msk.f32.mxu1 %vm2871_vm0, %v2870_v1 }
0x168d   :  { %2510 = vmatprep.subr.bf16.mxu1 %v2869_v0 }
0x1690   :  { %2512 = vmatpush3.bf16.msra.mxu1 %v3136_v62 }
0x1691   :  { %2519 = vmatprep.subr.bf16.mxu1 %v2869_v0 }
0x175e   :  { %v1147_v10 = vpop.f32.mrb[8].mxu1 }
0x175f   :  { %v3162_v11 = vadd.f32 %v2133_v8, %v1147_v10  ;;  %v2347_v12 = vpop.f32.mrb[9].mxu1 }
0x1761   :  { %v1227_v14 = vadd.f32 %v1223_v6, %v3162_v11 }
0x1763   :  { %2633 = vtanh.f32 %v1227_v14  ;;  %v2135_v16 = vmul.f32 -1.442695, %v1227_v14 }
0x1765   :  { %2635 = vpow2.f32 %v2135_v16 }
0x176d   :  { %v2634_v15 = vpop.eup %2633 }
0x176e   :  { %1237 = vrot.lane.b32.xlu0 %v2634_v15, %s2872_s12 }
0x176f   :  { %v2636_v17 = vpop.eup %2635 }
0x1770   :  { %v1231_v18 = vadd.f32 1.0, %v2636_v17 }
0x1772   :  { %2637 = vrcp.f32 %v1231_v18 }
0x177c   :  { %v2638_v19 = vpop.eup %2637 }
0x177d   :  { %v1235_v22 = vmul.f32 0.0, %v2638_v19 }
0x17e0   :  { %v1238_v20 = vpop.permute.xlu0 %1237 }
0x17e1   :  { %v1240_v21 = vmul.f32 %v2638_v19, %v1238_v20 }
0x17e3   :  { %1242 = vrot.lane.b32.xlu1 %v1240_v21, %s2872_s12 }
0x1855   :  { %v1243_v23 = vpop.permute.xlu1 %1242 }
0x1856   :  { %v1245_v24 = vadd.f32 %v1243_v23, %v1235_v22 }
0x1858   :  { %2639 = vtanh.f32 %v1245_v24  ;;  %v1339_v40 = vrot.slane %v1245_v24, 7 }
0x1862   :  { %v2640_v25 = vpop.eup %2639 }
0x1863   :  { %1248 = vrot.lane.b32.xlu0 %v2640_v25, %s2872_s12 }
0x18d5   :  { %v1249_v26 = vpop.permute.xlu0 %1248 }
0x18d6   :  { %v3168_v27 = vmul.f32 %v2638_v19, %v1249_v26 }
0x18d8   :  { %1253 = vrot.lane.b32.xlu1 %v3168_v27, %s2873_s3 }
0x194a   :  { %v1254_v28 = vpop.permute.xlu1 %1253 }
0x194b   :  { %2368 = vmatmul.mubr.msk.f32.vlgmr.msra.gmra.mrb[10].mxu1 %vm200_vm2, %v1254_v28 }
0x194c   :  { %2521 = vmatpush3.bf16.msra.mxu1 %v3132_v57  ;;  %2389 = vmatprep.mubr.msk.f32.mxu1 %vm2871_vm0, %v2870_v1 }
0x194d   :  { %2522 = vmatprep.subr.bf16.mxu1 %v2869_v0 }
0x1950   :  { %2524 = vmatpush3.bf16.msra.mxu1 %v3136_v62 }
0x1951   :  { %2531 = vmatprep.subr.bf16.mxu1 %v2869_v0 }
0x1a1e   :  { %v1323_v29 = vpop.f32.mrb[10].mxu1 }
0x1a1f   :  { %v1328_v30 = vrot.slane %v1323_v29, 7  ;;  %v2369_v31 = vpop.f32.mrb[11].mxu1 }
0x1a21   :  { %v1330_v32 = vadd.f32 %v1328_v30, %v3162_v11 }
0x1a23   :  { %2641 = vtanh.f32 %v1330_v32  ;;  %v2137_v34 = vmul.f32 -1.442695, %v1330_v32 }
0x1a25   :  { %2643 = vpow2.f32 %v2137_v34 }
0x1a2d   :  { %v2642_v33 = vpop.eup %2641 }
0x1a2e   :  { %1343 = vrot.lane.b32.xlu0 %v2642_v33, %s2872_s12 }
0x1a2f   :  { %v2644_v35 = vpop.eup %2643 }
0x1a30   :  { %v1334_v36 = vadd.f32 1.0, %v2644_v35 }
0x1a32   :  { %2645 = vrcp.f32 %v1334_v36 }
0x1a3c   :  { %v2646_v37 = vpop.eup %2645 }
0x1a3d   :  { %v1341_v41 = vmul.f32 %v2646_v37, %v1339_v40 }
0x1aa0   :  { %v1344_v38 = vpop.permute.xlu0 %1343 }
0x1aa1   :  { %v1346_v39 = vmul.f32 %v2646_v37, %v1344_v38 }
0x1aa3   :  { %1348 = vrot.lane.b32.xlu1 %v1346_v39, %s2872_s12 }
0x1b15   :  { %v1349_v42 = vpop.permute.xlu1 %1348 }
0x1b16   :  { %v1351_v43 = vadd.f32 %v1349_v42, %v1341_v41 }
0x1b18   :  { %2647 = vtanh.f32 %v1351_v43  ;;  %v1446_v60 = vrot.slane %v1351_v43, 7 }
0x1b22   :  { %v2648_v44 = vpop.eup %2647 }
0x1b23   :  { %1354 = vrot.lane.b32.xlu0 %v2648_v44, %s2872_s12 }
0x1b95   :  { %v1355_v45 = vpop.permute.xlu0 %1354 }
0x1b96   :  { %v1357_v46 = vmul.f32 %v2646_v37, %v1355_v45 }
0x1b98   :  { %v1359_v47 = vrot.slane %v1357_v46, 1  ;;  %v2000_v4 = vsel %vm1047_vm3, %v3168_v27, %v1357_v46 }
0x1b9a   :  { %1360 = vrot.lane.b32.xlu1 %v1359_v47, %s2873_s3 }
0x1c0c   :  { %v1361_v48 = vpop.permute.xlu1 %1360 }
0x1c0d   :  { %2379 = vmatmul.mubr.msk.f32.vlgmr.msra.gmra.mrb[12].mxu0 %vm200_vm2, %v1361_v48 }
0x1c0e   :  { %2527 = vmatpush3.bf16.msra.mxu0 %v3132_v57  ;;  %2400 = vmatprep.mubr.msk.f32.mxu0 %vm2871_vm0, %v2870_v1 }
0x1c0f   :  { %2528 = vmatprep.subr.bf16.mxu0 %v2869_v0 }
0x1c12   :  { %2530 = vmatpush3.bf16.msra.mxu0 %v3136_v62 }
0x1c13   :  { %2537 = vmatprep.subr.bf16.mxu0 %v2869_v0 }
0x1ce0   :  { %v1430_v49 = vpop.f32.mrb[12].mxu0 }
0x1ce1   :  { %v1435_v50 = vrot.slane %v1430_v49, 6  ;;  %v2380_v51 = vpop.f32.mrb[13].mxu0 }
0x1ce3   :  { %v1437_v13 = vadd.f32 %v1435_v50, %v3162_v11 }
0x1ce5   :  { %2649 = vtanh.f32 %v1437_v13  ;;  %v2139_v53 = vmul.f32 -1.442695, %v1437_v13 }
0x1ce7   :  { %2651 = vpow2.f32 %v2139_v53 }
0x1cef   :  { %v2650_v52 = vpop.eup %2649 }
0x1cf0   :  { %1450 = vrot.lane.b32.xlu0 %v2650_v52, %s2872_s12 }
0x1cf1   :  { %v2652_v54 = vpop.eup %2651 }
0x1cf2   :  { %v1441_v55 = vadd.f32 1.0, %v2652_v54 }
0x1cf4   :  { %2653 = vrcp.f32 %v1441_v55 }
0x1cfe   :  { %v2654_v56 = vpop.eup %2653 }
0x1cff   :  { %v1448_v61 = vmul.f32 %v2654_v56, %v1446_v60 }
0x1d62   :  { %v1451_v58 = vpop.permute.xlu0 %1450 }
0x1d63   :  { %v1453_v59 = vmul.f32 %v2654_v56, %v1451_v58 }
0x1d65   :  { %1455 = vrot.lane.b32.xlu1 %v1453_v59, %s2872_s12 }
0x1dd7   :  { %v1456_v5 = vpop.permute.xlu1 %1455 }
0x1dd8   :  { %v1458_v63 = vadd.f32 %v1456_v5, %v1448_v61 }
0x1dda   :  { %2655 = vtanh.f32 %v1458_v63  ;;  %v1553_v23 = vrot.slane %v1458_v63, 7 }
0x1de4   :  { %v2656_v2 = vpop.eup %2655 }
0x1de5   :  { %1461 = vrot.lane.b32.xlu0 %v2656_v2, %s2872_s12 }
0x1e57   :  { %v1462_v3 = vpop.permute.xlu0 %1461 }
0x1e58   :  { %v1464_v9 = vmul.f32 %v2654_v56, %v1462_v3 }
0x1e5a   :  { %v1466_v6 = vrot.slane %v1464_v9, 2  ;;  %v2001_v7 = vsel %vm1049_vm4, %v2000_v4, %v1464_v9 }
0x1e5c   :  { %1467 = vrot.lane.b32.xlu1 %v1466_v6, %s2873_s3 }
0x1ece   :  { %v1468_v8 = vpop.permute.xlu1 %1467 }
0x1ecf   :  { %2390 = vmatmul.mubr.msk.f32.vlgmr.msra.gmra.mrb[12].mxu1 %vm200_vm2, %v1468_v8 }
0x1ed0   :  { %2533 = vmatpush3.bf16.msra.mxu1 %v3132_v57  ;;  %2411 = vmatprep.mubr.msk.f32.mxu1 %vm2871_vm0, %v2870_v1 }
0x1ed1   :  { %2534 = vmatprep.subr.bf16.mxu1 %v2869_v0 }
0x1ed4   :  { %2536 = vmatpush3.bf16.msra.mxu1 %v3136_v62 }
0x1ed5   :  { %2543 = vmatprep.subr.bf16.mxu1 %v2869_v0 }
0x1fa2   :  { %v1537_v10 = vpop.f32.mrb[12].mxu1 }
0x1fa3   :  { %v1542_v12 = vrot.slane %v1537_v10, 5  ;;  %v2391_v14 = vpop.f32.mrb[13].mxu1 }
0x1fa5   :  { %v1544_v15 = vadd.f32 %v1542_v12, %v3162_v11 }
0x1fa7   :  { %2657 = vtanh.f32 %v1544_v15  ;;  %v2141_v17 = vmul.f32 -1.442695, %v1544_v15 }
0x1fa9   :  { %2659 = vpow2.f32 %v2141_v17 }
0x1fb1   :  { %v2658_v16 = vpop.eup %2657 }
0x1fb2   :  { %1557 = vrot.lane.b32.xlu0 %v2658_v16, %s2872_s12 }
0x1fb3   :  { %v2660_v18 = vpop.eup %2659 }
0x1fb4   :  { %v1548_v19 = vadd.f32 1.0, %v2660_v18 }
0x1fb6   :  { %2661 = vrcp.f32 %v1548_v19 }
0x1fc0   :  { %v2662_v20 = vpop.eup %2661 }
0x1fc1   :  { %v1555_v24 = vmul.f32 %v2662_v20, %v1553_v23 }
0x2024   :  { %v1558_v21 = vpop.permute.xlu0 %1557 }
0x2025   :  { %v1560_v22 = vmul.f32 %v2662_v20, %v1558_v21 }
0x2027   :  { %1562 = vrot.lane.b32.xlu1 %v1560_v22, %s2872_s12 }
0x2099   :  { %v1563_v25 = vpop.permute.xlu1 %1562 }
0x209a   :  { %v1565_v26 = vadd.f32 %v1563_v25, %v1555_v24 }
0x209c   :  { %2663 = vtanh.f32 %v1565_v26  ;;  %v1660_v44 = vrot.slane %v1565_v26, 7 }
0x20a6   :  { %v2664_v27 = vpop.eup %2663 }
0x20a7   :  { %1568 = vrot.lane.b32.xlu0 %v2664_v27, %s2872_s12 }
0x2119   :  { %v1569_v28 = vpop.permute.xlu0 %1568 }
0x211a   :  { %v1571_v29 = vmul.f32 %v2662_v20, %v1569_v28 }
0x211c   :  { %v1573_v30 = vrot.slane %v1571_v29, 3  ;;  %v2002_v31 = vsel %vm1051_vm5, %v2001_v7, %v1571_v29 }
0x211e   :  { %1574 = vrot.lane.b32.xlu1 %v1573_v30, %s2873_s3 }
0x2190   :  { %v1575_v32 = vpop.permute.xlu1 %1574 }
0x2191   :  { %2401 = vmatmul.mubr.msk.f32.vlgmr.msra.gmra.mrb[14].mxu0 %vm200_vm2, %v1575_v32 }
0x2192   :  { %2539 = vmatpush3.bf16.msra.mxu0 %v3132_v57  ;;  %2422 = vmatprep.mubr.msk.f32.mxu0 %vm2871_vm0, %v2870_v1 }
0x2193   :  { %2540 = vmatprep.subr.bf16.mxu0 %v2869_v0 }
0x2196   :  { %2542 = vmatpush3.bf16.msra.mxu0 %v3136_v62 }
0x2197   :  { %2549 = vmatprep.subr.bf16.mxu0 %v2869_v0 }
0x2264   :  { %v1644_v33 = vpop.f32.mrb[14].mxu0 }
0x2265   :  { %v1649_v34 = vrot.slane %v1644_v33, 4  ;;  %v2402_v35 = vpop.f32.mrb[15].mxu0 }
0x2267   :  { %v1651_v36 = vadd.f32 %v1649_v34, %v3162_v11 }
0x2269   :  { %2665 = vtanh.f32 %v1651_v36  ;;  %v2143_v38 = vmul.f32 -1.442695, %v1651_v36 }
0x226b   :  { %2667 = vpow2.f32 %v2143_v38 }
0x2273   :  { %v2666_v37 = vpop.eup %2665 }
0x2274   :  { %1664 = vrot.lane.b32.xlu0 %v2666_v37, %s2872_s12 }
0x2275   :  { %v2668_v39 = vpop.eup %2667 }
0x2276   :  { %v1655_v40 = vadd.f32 1.0, %v2668_v39 }
0x2278   :  { %2669 = vrcp.f32 %v1655_v40 }
0x2282   :  { %v2670_v41 = vpop.eup %2669 }
0x2283   :  { %v1662_v45 = vmul.f32 %v2670_v41, %v1660_v44 }
0x22e6   :  { %v1665_v42 = vpop.permute.xlu0 %1664 }
0x22e7   :  { %v1667_v43 = vmul.f32 %v2670_v41, %v1665_v42 }
0x22e9   :  { %1669 = vrot.lane.b32.xlu1 %v1667_v43, %s2872_s12 }
0x235b   :  { %v1670_v46 = vpop.permute.xlu1 %1669 }
0x235c   :  { %v1672_v47 = vadd.f32 %v1670_v46, %v1662_v45 }
0x235e   :  { %2671 = vtanh.f32 %v1672_v47 }
0x2368   :  { %v2672_v48 = vpop.eup %2671 }
0x2369   :  { %1675 = vrot.lane.b32.xlu0 %v2672_v48, %s2872_s12 }
0x23db   :  { %v1676_v49 = vpop.permute.xlu0 %1675 }
0x23dc   :  { %v1678_v50 = vmul.f32 %v2670_v41, %v1676_v49  ;;  %v2013_v49 = vld [vmem:[#allocation13] sm:$0xff] }
0x23de   :  { %v1680_v51 = vrot.slane %v1678_v50, 4  ;;  %v2003_v13 = vsel %vm1053_vm6, %v2002_v31, %v1678_v50  ;;  %v2014_v50 = vld [vmem:[#allocation13 + $0x8] sm:$0xff] }
0x23e0   :  { %1681 = vrot.lane.b32.xlu1 %v1680_v51, %s2873_s3  ;;  %v2550_v51 = vpack.c.bf16 %v2014_v50, %v2013_v49 }
0x2452   :  { %v1682_v52 = vpop.permute.xlu1 %1681 }
0x2453   :  { %2412 = vmatmul.mubr.msk.f32.vlgmr.msra.gmra.mrb[14].mxu1 %vm200_vm2, %v1682_v52  ;;  %v2016_v52 = vld [vmem:[#allocation13 + $0x18] sm:$0xff] }
0x2454   :  { %2545 = vmatpush3.bf16.msra.mxu1 %v3132_v57  ;;  %2433 = vmatprep.mubr.msk.f32.mxu1 %vm2871_vm0, %v2870_v1 }
0x2455   :  { %2546 = vmatprep.subr.bf16.mxu1 %v2869_v0 }
0x2458   :  { %2548 = vmatpush3.bf16.msra.mxu1 %v3136_v62  ;;  %v1767_v62 = vrot.slane %v1672_v47, 7 }
0x2526   :  { %v1751_v53 = vpop.f32.mrb[14].mxu1 }
0x2527   :  { %v1756_v54 = vrot.slane %v1751_v53, 3  ;;  %v2413_v55 = vpop.f32.mrb[15].mxu1 }
0x2529   :  { %v1758_v56 = vadd.f32 %v1756_v54, %v3162_v11 }
0x252b   :  { %2673 = vtanh.f32 %v1758_v56  ;;  %v2145_v59 = vmul.f32 -1.442695, %v1758_v56 }
0x252d   :  { %2675 = vpow2.f32 %v2145_v59 }
0x2535   :  { %v2674_v58 = vpop.eup %2673 }
0x2536   :  { %1771 = vrot.lane.b32.xlu0 %v2674_v58, %s2872_s12 }
0x2537   :  { %v2676_v60 = vpop.eup %2675 }
0x2538   :  { %v1762_v57 = vadd.f32 1.0, %v2676_v60  ;;  %v2150_v60 = vld [vmem:[%s3279_s8] ss:$0 sm:$0xff] }
0x253a   :  { %2677 = vrcp.f32 %v1762_v57 }
0x2544   :  { %v2678_v61 = vpop.eup %2677 }
0x2545   :  { %v1769_v2 = vmul.f32 %v2678_v61, %v1767_v62 }
0x25a8   :  { %v1772_v5 = vpop.permute.xlu0 %1771 }
0x25a9   :  { %v1774_v63 = vmul.f32 %v2678_v61, %v1772_v5 }
0x25ab   :  { %1776 = vrot.lane.b32.xlu1 %v1774_v63, %s2872_s12 }
0x261d   :  { %v1777_v3 = vpop.permute.xlu1 %1776 }
0x261e   :  { %v1779_v9 = vadd.f32 %v1777_v3, %v1769_v2 }
0x2620   :  { %2679 = vtanh.f32 %v1779_v9 }
0x262a   :  { %v2680_v4 = vpop.eup %2679 }
0x262b   :  { %1782 = vrot.lane.b32.xlu0 %v2680_v4, %s2872_s12 }
0x269d   :  { %v1783_v6 = vpop.permute.xlu0 %1782 }
0x269e   :  { %v1785_v7 = vmul.f32 %v2678_v61, %v1783_v6 }
0x26a0   :  { %v1787_v8 = vrot.slane %v1785_v7, 5  ;;  %v2004_v10 = vsel %vm1055_vm7, %v2003_v13, %v1785_v7  ;;  %v2015_v13 = vld [vmem:[#allocation13 + $0x10] sm:$0xff] }
0x26a1   :  { %v2553_v53 = vpack.c.bf16 %v2016_v52, %v2015_v13 }
0x26a2   :  { %1788 = vrot.lane.b32.xlu1 %v1787_v8, %s2873_s3 }
0x2714   :  { %v1789_v12 = vpop.permute.xlu1 %1788 }
0x2715   :  { %2423 = vmatmul.mubr.msk.f32.vlgmr.msra.gmra.mrb[16].mxu0 %vm200_vm2, %v1789_v12 }
0x2716   :  { %2444 = vmatprep.mubr.msk.f32.mxu0 %vm2871_vm0, %v2870_v1  ;;  %v1874_v1 = vrot.slane %v1779_v9, 7  ;;  %2551 = vmatpush3.bf16.msra.mxu0 %v2550_v51 }
0x2717   :  { %2552 = vmatprep.subr.bf16.mxu0 %v2869_v0 }
0x271a   :  { %2554 = vmatpush3.bf16.msra.mxu0 %v2553_v53 }
0x27e8   :  { %v1858_v14 = vpop.f32.mrb[16].mxu0 }
0x27e9   :  { %v1863_v15 = vrot.slane %v1858_v14, 2  ;;  %v2424_v16 = vpop.f32.mrb[17].mxu0 }
0x27eb   :  { %v1865_v17 = vadd.f32 %v1863_v15, %v3162_v11 }
0x27ed   :  { %2681 = vtanh.f32 %v1865_v17  ;;  %v2147_v19 = vmul.f32 -1.442695, %v1865_v17 }
0x27ef   :  { %2683 = vpow2.f32 %v2147_v19 }
0x27f7   :  { %v2682_v18 = vpop.eup %2681 }
0x27f8   :  { %1878 = vrot.lane.b32.xlu0 %v2682_v18, %s2872_s12 }
0x27f9   :  { %v2684_v20 = vpop.eup %2683 }
0x27fa   :  { %v1869_v21 = vadd.f32 1.0, %v2684_v20 }
0x27fc   :  { %2685 = vrcp.f32 %v1869_v21 }
0x2806   :  { %v2686_v22 = vpop.eup %2685 }
0x2807   :  { %v1876_v25 = vmul.f32 %v2686_v22, %v1874_v1 }
0x286a   :  { %v1879_v23 = vpop.permute.xlu0 %1878 }
0x286b   :  { %v1881_v24 = vmul.f32 %v2686_v22, %v1879_v23 }
0x286d   :  { %1883 = vrot.lane.b32.xlu1 %v1881_v24, %s2872_s12 }
0x28df   :  { %v1884_v26 = vpop.permute.xlu1 %1883 }
0x28e0   :  { %v1886_v27 = vadd.f32 %v1884_v26, %v1876_v25 }
0x28e2   :  { %2687 = vtanh.f32 %v1886_v27  ;;  %v1981_v45 = vrot.slane %v1886_v27, 7 }
0x28ec   :  { %v2688_v28 = vpop.eup %2687 }
0x28ed   :  { %1889 = vrot.lane.b32.xlu0 %v2688_v28, %s2872_s12 }
0x295f   :  { %v1890_v29 = vpop.permute.xlu0 %1889 }
0x2960   :  { %v1892_v30 = vmul.f32 %v2686_v22, %v1890_v29 }
0x2962   :  { %v1894_v31 = vrot.slane %v1892_v30, 6  ;;  %v2005_v32 = vsel %vm1057_vm8, %v2004_v10, %v1892_v30 }
0x2964   :  { %1895 = vrot.lane.b32.xlu1 %v1894_v31, %s2873_s3 }
0x29d6   :  { %v1896_v33 = vpop.permute.xlu1 %1895 }
0x29d7   :  { %2434 = vmatmul.mubr.msk.f32.vlgmr.msra.gmra.mrb[16].mxu1 %vm200_vm2, %v1896_v33 }
0x2aaa   :  { %v1965_v34 = vpop.f32.mrb[16].mxu1 }
0x2aab   :  { %v1970_v35 = vrot.slane %v1965_v34, 1  ;;  %v2435_v36 = vpop.f32.mrb[17].mxu1 }
0x2aad   :  { %v1972_v37 = vadd.f32 %v1970_v35, %v3162_v11 }
0x2aaf   :  { %2689 = vtanh.f32 %v1972_v37  ;;  %v2149_v39 = vmul.f32 -1.442695, %v1972_v37 }
0x2ab1   :  { %2691 = vpow2.f32 %v2149_v39 }
0x2ab9   :  { %v2690_v38 = vpop.eup %2689 }
0x2aba   :  { %1985 = vrot.lane.b32.xlu0 %v2690_v38, %s2872_s12 }
0x2abb   :  { %v2692_v40 = vpop.eup %2691 }
0x2abc   :  { %v1976_v41 = vadd.f32 1.0, %v2692_v40 }
0x2abe   :  { %2693 = vrcp.f32 %v1976_v41 }
0x2ac8   :  { %v2694_v42 = vpop.eup %2693 }
0x2ac9   :  { %v1983_v46 = vmul.f32 %v2694_v42, %v1981_v45 }
0x2b2c   :  { %v1986_v43 = vpop.permute.xlu0 %1985 }
0x2b2d   :  { %v1988_v44 = vmul.f32 %v2694_v42, %v1986_v43 }
0x2b2f   :  { %1990 = vrot.lane.b32.xlu1 %v1988_v44, %s2872_s12 }
0x2ba1   :  { %v1991_v47 = vpop.permute.xlu1 %1990 }
0x2ba2   :  { %v1993_v48 = vadd.f32 %v1991_v47, %v1983_v46 }
0x2ba4   :  { %2695 = vtanh.f32 %v1993_v48 }
0x2bae   :  { %v2696_v11 = vpop.eup %2695 }
0x2baf   :  { %1996 = vrot.lane.b32.xlu0 %v2696_v11, %s2872_s12 }
0x2c21   :  { %v1997_v54 = vpop.permute.xlu0 %1996 }
0x2c22   :  { %v1999_v55 = vmul.f32 %v2694_v42, %v1997_v54 }
0x2c24   :  { %v2006_v56 = vsel %vm1059_vm9, %v2005_v32, %v1999_v55 }
0x2c25   :  { %2008 = vrot.lane.b32.xlu1 %v2006_v56, %s2873_s3 }
0x2c97   :  { %v2009_v58 = vpop.permute.xlu1 %2008 }
0x2c98   :  { %2011 = vst.msk [vmem:[#allocation3] sm:$0xff] %vm200_vm2, %v2009_v58 }
0x2c9f   :  { %v2012_v59 = vld [vmem:[#allocation3] sm:$0xff] }
0x2ca0   :  { %2445 = vmatmul.mubr.msk.f32.vlgmr.msra.gmra.mrb[18].mxu0 %vm200_vm2, %v2012_v59 }
0x2d73   :  { %v2093_v0 = vpop.f32.mrb[18].mxu0 }
0x2d74   :  { %v2094_v57 = vadd.f32 %v2150_v60, %v2093_v0  ;;  %v2446_v61 = vpop.f32.mrb[19].mxu0 }
0x2d76   :  { %2097 = vst [vmem:[#allocation15] sm:$0xff] %v2094_v57 }
0x2d77   :  { %2840 = shalt.err (!%p2837_p10)
}
0x2d78   :  { %s2841_s4 = scalar_lea.hbm %s3280_s9, 128 }
0x2d79   :  { %p2842_p11 = scmp.ne.s32.totalorder %s3280_s9, %s2841_s4  ;;  %p2845_p12 = scmp.lt.u32.totalorder %s2841_s4, %s3280_s9 }
0x2d7b   :  { %p2847_p13 = pnand %p2845_p12, %p2842_p11 }
0x2d7d   :  { %2850 = shalt.err (!%p2847_p13)
}
0x2d7e   :  { %2107 = dma.vmem_to_hbm [thread:$0]  %s2105_s19, 128, %s3280_s9, [#allocation6]  }
0x2d7f   :  { %2859 = dma.done.wait [#allocation6], 128  }
0x2d80   :  { %2860 = vsyncadd [#allocation6], 4294967168 }
0x2d81   :  { %2111 = vsyncpa [#allocation5], 1 }
0x2d82   :  { %2112 = vsyncpa [#allocation8], 1 }
0x2d83   :  { %2113 = vsyncpa [#allocation11], 1 }
0x2d84   :  { %2114 = vsyncpa [#allocation14], 1 }
0x2d85   :  { %2115 = vsyncpa [#allocation6], 1 }

</bundles_post_ra>
